<compile_context>
chip_gen: v5e
topology: v5e:2x2
jax: 0.10.0
libtpu: 0.0.40
codegen_flags: <defaults>
</compile_context>

<pallas_src>
import functools

import jax
import jax.numpy as jnp
from jax.experimental import pallas as pl
from jax.experimental.pallas import tpu as pltpu

# ----------------------------- demo configuration ---------------------------
NUM_LAYERS = 2     # num_layers
HIDDEN = 32        # hidden_size
HEADS = 4          # num_heads  (head_dim = 8)
D_FF = 64          # d_ff
IN_VOCAB = 128     # input_vocab_size
OUT_VOCAB = 10     # output_vocab_size
VO_PAD = 128       # classifier output padded to a full 128-lane tile
SEQ = 8            # sequence length
BATCH = 2          # batch size
MAX_LEN = 64       # positional-encoding table length (>= SEQ)


# -----------------------------------------------------------------------------
# Fused transformer kernel: one grid step == NB sequences.
# -----------------------------------------------------------------------------
def _transformer_kernel(tok_ref, embpe_ref, wqkv_ref, wmats_ref, small_ref,
                        wfcb_ref, out_ref, *, num_heads, seq_len, nb, in_vocab):
    """
    tok_ref   : (B, S) int32 in SMEM (scalar prefetch) — token ids
    embpe_ref : (Vi + S, E)   rows [0:Vi] embedding table, [Vi:Vi+S] pos-enc
    wqkv_ref  : (L, E, 3E)    fused q/k/v projection (q block pre-scaled)
    wmats_ref : (L, 2E+F, F)  rows [0:E]=wo(:, :E), [E:2E]=w1, [2E:2E+F]=w2(:, :E)
    small_ref : (L, 8, 3E)    rows: bqkv | bo | ln1_g | ln1_b | b1 | b2 | ln2_g | ln2_b
    wfcb_ref  : (E+1, VO_PAD) rows [0:E]=wfc, [E]=bfc (lane-padded classifier)
    out_ref   : (1, L, NB*S, VO_PAD)  per-layer logits for this grid step
    """
    S, NB, Vi, H = seq_len, nb, in_vocab, num_heads
    E = wqkv_ref.shape[1]
    F = wmats_ref.shape[2]
    L = wqkv_ref.shape[0]
    Dh = E // H
    R = NB * S
    f32 = jnp.float32
    g = pl.program_id(0)

    def layernorm(v, gamma, beta, eps=1e-5):
        mu = jnp.mean(v, axis=-1, keepdims=True)
        c = v - mu
        var = jnp.mean(c * c, axis=-1, keepdims=True)
        return c * jax.lax.rsqrt(var + eps) * gamma + beta

    # ---- embedding lookup: one-hot rows built from SMEM token scalars -------
    lane = jax.lax.broadcasted_iota(jnp.int32, (1, Vi), 1)
    rows = []
    for n in range(NB):                                    # static unroll
        b = g * NB + n
        for s in range(S):
            rows.append((lane == tok_ref[b, s]).astype(f32))
    onehot = jnp.concatenate(rows, axis=0)                 # (R, Vi)

    emb = embpe_ref[:Vi, :]                                # (Vi, E)
    pe = embpe_ref[Vi:, :]                                 # (S, E)
    if NB > 1:
        pe = jnp.concatenate([pe] * NB, axis=0)            # (R, E)
    x = jnp.dot(onehot, emb, preferred_element_type=f32) + pe   # (R, E)

    # ---- classifier weights hoisted above the unrolled layer loop -----------
    wfc = wfcb_ref[:E, :]                                  # (E, VO_PAD)
    bfc = wfcb_ref[E:E + 1, :]                             # (1, VO_PAD)

    for l in range(L):                                     # static unroll
        # ---------------- multi-head self-attention (dropout = identity) -----
        # One fused projection push: (R,E) @ (E,3E)  (+ one bias broadcast)
        qkv = (jnp.dot(x, wqkv_ref[l], preferred_element_type=f32)
               + small_ref[l, 0:1, :])                      # (R, 3E)

        ctx_rows = []
        for n in range(NB):                                 # NB is tiny/static
            blk = qkv[n * S:(n + 1) * S, :]                 # (S, 3E)
            # head-batched attention: (H,S,Dh) operands, one softmax
            q = blk[:, :E].reshape(S, H, Dh).transpose(1, 0, 2)
            k = blk[:, E:2 * E].reshape(S, H, Dh).transpose(1, 0, 2)
            v = blk[:, 2 * E:].reshape(S, H, Dh).transpose(1, 0, 2)
            sc = jnp.einsum('hqd,hkd->hqk', q, k,
                            preferred_element_type=f32)     # (H, S, S)
            sc = sc - jnp.max(sc, axis=-1, keepdims=True)
            p = jnp.exp(sc)
            p = p * pl.reciprocal(jnp.sum(p, axis=-1, keepdims=True),
                                  approx=True)
            ctx = jnp.einsum('hqk,hkd->hqd', p, v,
                             preferred_element_type=f32)    # (H, S, Dh)
            ctx_rows.append(ctx.transpose(1, 0, 2).reshape(S, E))
        heads = ctx_rows[0] if NB == 1 else jnp.concatenate(ctx_rows, axis=0)

        wo = wmats_ref[l, :E, :E]
        attn = (jnp.dot(heads, wo, preferred_element_type=f32)
                + small_ref[l, 1:2, :E])
        # torch: `x += dropout(norm1(attn))` mutates the shared input in-place,
        # so this residual update is carried into the next encoder layer.
        x = x + layernorm(attn, small_ref[l, 2:3, :E], small_ref[l, 3:4, :E])

        # ---------------- feed-forward ---------------------------------------
        w1 = wmats_ref[l, E:2 * E, :F]
        w2 = wmats_ref[l, 2 * E:2 * E + F, :E]
        hdn = jnp.maximum(jnp.dot(x, w1, preferred_element_type=f32)
                          + small_ref[l, 4:5, :F], 0.0)
        ff = (jnp.dot(hdn, w2, preferred_element_type=f32)
              + small_ref[l, 5:6, :E])
        ret = x + layernorm(ff, small_ref[l, 6:7, :E], small_ref[l, 7:8, :E])

        # ---------------- final classifier on this layer's output ------------
        out_ref[0, l] = (jnp.dot(ret, wfc, preferred_element_type=f32) + bfc)


# -----------------------------------------------------------------------------
# Parameters (deterministic), sinusoidal positional encoding, kernel packing.
# -----------------------------------------------------------------------------
def make_pe(max_len, d_model):
    pos = jnp.arange(max_len, dtype=jnp.float32)[:, None]
    div = jnp.exp(jnp.arange(0, d_model, 2, dtype=jnp.float32)
                  * (-jnp.log(10000.0) / d_model))
    ang = pos * div
    return jnp.stack([jnp.sin(ang), jnp.cos(ang)], axis=-1).reshape(max_len,
                                                                    d_model)


def init_params(key):
    E, F, L = HIDDEN, D_FF, NUM_LAYERS
    Vi, Vo = IN_VOCAB, OUT_VOCAB
    ks = jax.random.split(key, 8)

    def uniform(k, shape, bound):
        return jax.random.uniform(k, shape, jnp.float32, -bound, bound)

    p = {}
    p["emb"] = jax.random.normal(ks[0], (Vi, E), jnp.float32)    # nn.Embedding
    p["pe"] = make_pe(MAX_LEN, E)
    xav = (6.0 / (2 * E)) ** 0.5
    p["wqkv"] = uniform(ks[1], (L, 3, E, E), xav)                # xavier-like
    p["bqkv"] = jnp.zeros((L, 3, 1, E), jnp.float32)
    p["wo"] = uniform(ks[2], (L, E, E), E ** -0.5)
    p["bo"] = jnp.zeros((L, 1, E), jnp.float32)
    p["ln1"] = jnp.stack([jnp.ones((L, 1, E), jnp.float32),
                          jnp.zeros((L, 1, E), jnp.float32)], axis=1)
    p["w1"] = uniform(ks[3], (L, E, F), E ** -0.5)
    p["b1"] = uniform(ks[4], (L, 1, F), E ** -0.5)
    p["w2"] = uniform(ks[5], (L, F, E), F ** -0.5)
    p["b2"] = uniform(ks[6], (L, 1, E), F ** -0.5)
    p["ln2"] = jnp.stack([jnp.ones((L, 1, E), jnp.float32),
                          jnp.zeros((L, 1, E), jnp.float32)], axis=1)
    wfc = uniform(ks[7], (E, Vo), E ** -0.5)
    # lane-pad the classifier to 128 output lanes (unmasked stores, dense MXU N)
    p["wfc"] = jnp.zeros((E, VO_PAD), jnp.float32).at[:, :Vo].set(wfc)
    p["bfc"] = jnp.zeros((1, VO_PAD), jnp.float32)
    return p


def pack_params(params, seq_len):
    """Pack parameters into the few slabs the kernel consumes (done once)."""
    E, F, L = HIDDEN, D_FF, NUM_LAYERS
    dh = E // HEADS
    scale = 1.0 / (dh ** 0.5)

    # embedding + positional-encoding rows in one slab
    embpe = jnp.concatenate([params["emb"], params["pe"][:seq_len]], axis=0)

    # fused q/k/v projection; fold the 1/sqrt(head_dim) scale into the Q block
    wq, wk, wv = (params["wqkv"][:, i] for i in range(3))
    wqkv = jnp.concatenate([wq * scale, wk, wv], axis=-1)        # (L, E, 3E)
    bq, bk, bv = (params["bqkv"][:, i] for i in range(3))
    bqkv = jnp.concatenate([bq * scale, bk, bv], axis=-1)        # (L, 1, 3E)

    def lane_pad(a, width):
        return jnp.pad(a, ((0, 0), (0, 0), (0, width - a.shape[-1])))

    # big-matrix slab: rows [wo | w1 | w2], lane-padded to F
    wmats = jnp.concatenate([lane_pad(params["wo"], F), params["w1"],
                             lane_pad(params["w2"], F)], axis=1)  # (L, 2E+F, F)

    def row(a):
        return lane_pad(a.reshape(L, 1, -1), 3 * E)

    # all small bias / layer-norm vectors in one slab
    small = jnp.concatenate(
        [bqkv, row(params["bo"]),
         row(params["ln1"][:, 0]), row(params["ln1"][:, 1]),
         row(params["b1"]), row(params["b2"]),
         row(params["ln2"][:, 0]), row(params["ln2"][:, 1])], axis=1)  # (L,8,3E)

    wfcb = jnp.concatenate([params["wfc"], params["bfc"]], axis=0)  # (E+1, 128)
    return {"embpe": embpe, "wqkv": wqkv, "wmats": wmats,
            "small": small, "wfcb": wfcb}


# -----------------------------------------------------------------------------
# Forward wrapper: one fused pallas_call over a small batch-parallel grid.
# -----------------------------------------------------------------------------
def forward(packed, tokens):
    """tokens: (S, B) int32 -> (num_layers, S, B, OUT_VOCAB) float32 logits."""
    S, B = tokens.shape
    E, F, L, Vi = HIDDEN, D_FF, NUM_LAYERS, IN_VOCAB
    # >=2 "parallel" grid steps keep both v7x TensorCores busy; batch is folded
    # into rows inside each step so single-TC v5e/v6e pay few serial steps.
    G = 2 if (B >= 2 and B % 2 == 0) else 1
    NB = B // G
    R = NB * S

    tok = jnp.transpose(tokens, (1, 0)).astype(jnp.int32)          # (B, S)

    kernel = functools.partial(_transformer_kernel, num_heads=HEADS,
                               seq_len=S, nb=NB, in_vocab=Vi)
    out = pl.pallas_call(
        kernel,
        out_shape=jax.ShapeDtypeStruct((G, L, R, VO_PAD), jnp.float32),
        grid_spec=pltpu.PrefetchScalarGridSpec(
            num_scalar_prefetch=1,                 # token ids -> SMEM
            grid=(G,),
            in_specs=[
                pl.BlockSpec((Vi + S, E), lambda g, t: (0, 0)),          # embpe
                pl.BlockSpec((L, E, 3 * E), lambda g, t: (0, 0, 0)),     # wqkv
                pl.BlockSpec((L, 2 * E + F, F), lambda g, t: (0, 0, 0)), # wmats
                pl.BlockSpec((L, 8, 3 * E), lambda g, t: (0, 0, 0)),     # small
                pl.BlockSpec((E + 1, VO_PAD), lambda g, t: (0, 0)),      # wfcb
            ],
            out_specs=pl.BlockSpec((1, L, R, VO_PAD),
                                   lambda g, t: (g, 0, 0, 0)),
        ),
        compiler_params=pltpu.CompilerParams(
            dimension_semantics=("parallel",),
            vmem_limit_bytes=32 * 1024 * 1024),
    )(tok, packed["embpe"], packed["wqkv"], packed["wmats"],
      packed["small"], packed["wfcb"])

    # (G, L, NB*S, VO_PAD) -> (L, S, B, OUT_VOCAB)
    out = out[..., :OUT_VOCAB].reshape(G, L, NB, S, OUT_VOCAB)
    return jnp.transpose(out, (1, 3, 0, 2, 4)).reshape(L, S, B, OUT_VOCAB)


if __name__ == "__main__":
    key = jax.random.PRNGKey(0)
    pkey, xkey = jax.random.split(key)
    params = init_params(pkey)
    packed = pack_params(params, SEQ)
    tokens = jax.random.randint(xkey, (SEQ, BATCH), 0, IN_VOCAB,
                                dtype=jnp.int32)

    fwd = jax.jit(forward)
    out = fwd(packed, tokens)
    jax.block_until_ready(out)
    assert out.shape == (NUM_LAYERS, SEQ, BATCH, OUT_VOCAB)
    assert out.dtype == jnp.float32
    print("KERNEL_OK")
</pallas_src>

<mosaic_0001>
module attributes {stable_mosaic.version = 11 : i64} {
  func.func @_transformer_kernel(%arg0: i32, %arg1: memref<2x8xi32, #tpu.memory_space<smem>>, %arg2: memref<136x32xf32, #tpu.memory_space<vmem>>, %arg3: memref<2x32x96xf32, #tpu.memory_space<vmem>>, %arg4: memref<2x128x64xf32, #tpu.memory_space<vmem>>, %arg5: memref<2x8x96xf32, #tpu.memory_space<vmem>>, %arg6: memref<33x128xf32, #tpu.memory_space<vmem>>, %arg7: memref<1x2x8x128xf32, #tpu.memory_space<vmem>>) attributes {dimension_semantics = [#tpu.dimension_semantics<parallel>], iteration_bounds = array<i64: 2>, scalar_prefetch = 1 : i64, scratch_operands = 0 : i64, tpu.core_type = #tpu.core_type<tc>, window_params = [{pipeline_mode = #tpu.pipeline_mode<synchronous>, transform_indices = @transform_0, window_bounds = array<i64: 136, 32>}, {pipeline_mode = #tpu.pipeline_mode<synchronous>, transform_indices = @transform_1, window_bounds = array<i64: 2, 32, 96>}, {pipeline_mode = #tpu.pipeline_mode<synchronous>, transform_indices = @transform_2, window_bounds = array<i64: 2, 128, 64>}, {pipeline_mode = #tpu.pipeline_mode<synchronous>, transform_indices = @transform_3, window_bounds = array<i64: 2, 8, 96>}, {pipeline_mode = #tpu.pipeline_mode<synchronous>, transform_indices = @transform_4, window_bounds = array<i64: 33, 128>}, {transform_indices = @transform_5, window_bounds = array<i64: 1, 2, 8, 128>}]} {
    %0 = tpu.iota {dimensions = array<i32: 1>} : vector<1x128xi32>
    %c1_i32 = arith.constant 1 : i32
    %1 = arith.muli %arg0, %c1_i32 : i32
    %c0_i32 = arith.constant 0 : i32
    %2 = arith.addi %1, %c0_i32 : i32
    %3 = arith.index_cast %2 : i32 to index
    %c0 = arith.constant 0 : index
    %4 = memref.load %arg1[%3, %c0] : memref<2x8xi32, #tpu.memory_space<smem>>
    %5 = vector.broadcast %4 : i32 to vector<1x128xi32>
    %6 = arith.cmpi eq, %0, %5 : vector<1x128xi32>
    %7 = arith.extui %6 : vector<1x128xi1> to vector<1x128xi32>
    %8 = arith.sitofp %7 : vector<1x128xi32> to vector<1x128xf32>
    %9 = arith.index_cast %2 : i32 to index
    %c1 = arith.constant 1 : index
    %10 = memref.load %arg1[%9, %c1] : memref<2x8xi32, #tpu.memory_space<smem>>
    %11 = vector.broadcast %10 : i32 to vector<1x128xi32>
    %12 = arith.cmpi eq, %0, %11 : vector<1x128xi32>
    %13 = arith.extui %12 : vector<1x128xi1> to vector<1x128xi32>
    %14 = arith.sitofp %13 : vector<1x128xi32> to vector<1x128xf32>
    %15 = arith.index_cast %2 : i32 to index
    %c2 = arith.constant 2 : index
    %16 = memref.load %arg1[%15, %c2] : memref<2x8xi32, #tpu.memory_space<smem>>
    %17 = vector.broadcast %16 : i32 to vector<1x128xi32>
    %18 = arith.cmpi eq, %0, %17 : vector<1x128xi32>
    %19 = arith.extui %18 : vector<1x128xi1> to vector<1x128xi32>
    %20 = arith.sitofp %19 : vector<1x128xi32> to vector<1x128xf32>
    %21 = arith.index_cast %2 : i32 to index
    %c3 = arith.constant 3 : index
    %22 = memref.load %arg1[%21, %c3] : memref<2x8xi32, #tpu.memory_space<smem>>
    %23 = vector.broadcast %22 : i32 to vector<1x128xi32>
    %24 = arith.cmpi eq, %0, %23 : vector<1x128xi32>
    %25 = arith.extui %24 : vector<1x128xi1> to vector<1x128xi32>
    %26 = arith.sitofp %25 : vector<1x128xi32> to vector<1x128xf32>
    %27 = arith.index_cast %2 : i32 to index
    %c4 = arith.constant 4 : index
    %28 = memref.load %arg1[%27, %c4] : memref<2x8xi32, #tpu.memory_space<smem>>
    %29 = vector.broadcast %28 : i32 to vector<1x128xi32>
    %30 = arith.cmpi eq, %0, %29 : vector<1x128xi32>
    %31 = arith.extui %30 : vector<1x128xi1> to vector<1x128xi32>
    %32 = arith.sitofp %31 : vector<1x128xi32> to vector<1x128xf32>
    %33 = arith.index_cast %2 : i32 to index
    %c5 = arith.constant 5 : index
    %34 = memref.load %arg1[%33, %c5] : memref<2x8xi32, #tpu.memory_space<smem>>
    %35 = vector.broadcast %34 : i32 to vector<1x128xi32>
    %36 = arith.cmpi eq, %0, %35 : vector<1x128xi32>
    %37 = arith.extui %36 : vector<1x128xi1> to vector<1x128xi32>
    %38 = arith.sitofp %37 : vector<1x128xi32> to vector<1x128xf32>
    %39 = arith.index_cast %2 : i32 to index
    %c6 = arith.constant 6 : index
    %40 = memref.load %arg1[%39, %c6] : memref<2x8xi32, #tpu.memory_space<smem>>
    %41 = vector.broadcast %40 : i32 to vector<1x128xi32>
    %42 = arith.cmpi eq, %0, %41 : vector<1x128xi32>
    %43 = arith.extui %42 : vector<1x128xi1> to vector<1x128xi32>
    %44 = arith.sitofp %43 : vector<1x128xi32> to vector<1x128xf32>
    %45 = arith.index_cast %2 : i32 to index
    %c7 = arith.constant 7 : index
    %46 = memref.load %arg1[%45, %c7] : memref<2x8xi32, #tpu.memory_space<smem>>
    %47 = vector.broadcast %46 : i32 to vector<1x128xi32>
    %48 = arith.cmpi eq, %0, %47 : vector<1x128xi32>
    %49 = arith.extui %48 : vector<1x128xi1> to vector<1x128xi32>
    %50 = arith.sitofp %49 : vector<1x128xi32> to vector<1x128xf32>
    %51 = tpu.concatenate %8, %14, %20, %26, %32, %38, %44, %50 in 0 : vector<1x128xf32>, vector<1x128xf32>, vector<1x128xf32>, vector<1x128xf32>, vector<1x128xf32>, vector<1x128xf32>, vector<1x128xf32>, vector<1x128xf32> -> vector<8x128xf32>
    %c0_0 = arith.constant 0 : index
    %c0_1 = arith.constant 0 : index
    %52 = vector.load %arg2[%c0_0, %c0_1] : memref<136x32xf32, #tpu.memory_space<vmem>>, vector<128x32xf32>
    %c128 = arith.constant 128 : index
    %c0_2 = arith.constant 0 : index
    %53 = vector.load %arg2[%c128, %c0_2] : memref<136x32xf32, #tpu.memory_space<vmem>>, vector<8x32xf32>
    %cst = arith.constant dense<0.000000e+00> : vector<8x32xf32>
    %54 = tpu.matmul %51, %52, %cst {dimension_numbers = #tpu.dot_dimension_numbers<[1], [0], [0], [1], [0, 0, 1, 1], [], []>} : vector<8x128xf32>, vector<128x32xf32>, vector<8x32xf32> -> vector<8x32xf32>
    %55 = arith.addf %54, %53 : vector<8x32xf32>
    %c0_3 = arith.constant 0 : index
    %c0_4 = arith.constant 0 : index
    %56 = vector.load %arg6[%c0_3, %c0_4] : memref<33x128xf32, #tpu.memory_space<vmem>>, vector<32x128xf32>
    %c32 = arith.constant 32 : index
    %c0_5 = arith.constant 0 : index
    %57 = vector.load %arg6[%c32, %c0_5] : memref<33x128xf32, #tpu.memory_space<vmem>>, vector<1x128xf32>
    %c0_6 = arith.constant 0 : index
    %c0_7 = arith.constant 0 : index
    %c0_8 = arith.constant 0 : index
    %58 = vector.load %arg3[%c0_6, %c0_7, %c0_8] : memref<2x32x96xf32, #tpu.memory_space<vmem>>, vector<1x32x96xf32>
    %59 = vector.shape_cast %58 : vector<1x32x96xf32> to vector<32x96xf32>
    %cst_9 = arith.constant dense<0.000000e+00> : vector<8x96xf32>
    %60 = tpu.matmul %55, %59, %cst_9 {dimension_numbers = #tpu.dot_dimension_numbers<[1], [0], [0], [1], [0, 0, 1, 1], [], []>} : vector<8x32xf32>, vector<32x96xf32>, vector<8x96xf32> -> vector<8x96xf32>
    %c0_10 = arith.constant 0 : index
    %c0_11 = arith.constant 0 : index
    %c0_12 = arith.constant 0 : index
    %61 = vector.load %arg5[%c0_10, %c0_11, %c0_12] : memref<2x8x96xf32, #tpu.memory_space<vmem>>, vector<1x1x96xf32>
    %62 = vector.shape_cast %61 : vector<1x1x96xf32> to vector<1x96xf32>
    %63 = vector.broadcast %62 : vector<1x96xf32> to vector<8x96xf32>
    %64 = arith.addf %60, %63 : vector<8x96xf32>
    %65 = vector.extract_strided_slice %64 {offsets = [0, 0], sizes = [8, 32], strides = [1, 1]} : vector<8x96xf32> to vector<8x32xf32>
    %66 = vector.shape_cast %65 : vector<8x32xf32> to vector<8x4x8xf32>
    %67 = tpu.transpose %66, [1, 0, 2] : vector<8x4x8xf32> -> vector<4x8x8xf32>
    %68 = vector.extract_strided_slice %64 {offsets = [0, 32], sizes = [8, 32], strides = [1, 1]} : vector<8x96xf32> to vector<8x32xf32>
    %69 = vector.shape_cast %68 : vector<8x32xf32> to vector<8x4x8xf32>
    %70 = tpu.transpose %69, [1, 0, 2] : vector<8x4x8xf32> -> vector<4x8x8xf32>
    %71 = vector.extract_strided_slice %64 {offsets = [0, 64], sizes = [8, 32], strides = [1, 1]} : vector<8x96xf32> to vector<8x32xf32>
    %72 = vector.shape_cast %71 : vector<8x32xf32> to vector<8x4x8xf32>
    %73 = tpu.transpose %72, [1, 0, 2] : vector<8x4x8xf32> -> vector<4x8x8xf32>
    "tpu.trace_start"() <{level = 10 : i32, message = "hqd,hkd->hqk"}> : () -> ()
    %cst_13 = arith.constant dense<0.000000e+00> : vector<4x8x8xf32>
    %74 = tpu.matmul %67, %70, %cst_13 {dimension_numbers = #tpu.dot_dimension_numbers<[2], [2], [1], [1], [0, 0, 0, 1, 1, 1], [0], [0]>} : vector<4x8x8xf32>, vector<4x8x8xf32>, vector<4x8x8xf32> -> vector<4x8x8xf32>
    "tpu.trace_stop"() : () -> ()
    %cst_14 = arith.constant dense<0xFF800000> : vector<4x8xf32>
    %75 = vector.multi_reduction <maximumf>, %74, %cst_14 [2] : vector<4x8x8xf32> to vector<4x8xf32>
    %76 = vector.shape_cast %75 : vector<4x8xf32> to vector<4x8x1xf32>
    %77 = vector.broadcast %76 : vector<4x8x1xf32> to vector<4x8x8xf32>
    %78 = arith.subf %74, %77 : vector<4x8x8xf32>
    %79 = math.exp %78 : vector<4x8x8xf32>
    %cst_15 = arith.constant dense<0.000000e+00> : vector<4x8xf32>
    %80 = vector.multi_reduction <add>, %79, %cst_15 [2] : vector<4x8x8xf32> to vector<4x8xf32>
    %81 = vector.shape_cast %80 : vector<4x8xf32> to vector<4x8x1xf32>
    %82 = tpu.reciprocal %81 {approx = true} : vector<4x8x1xf32> -> vector<4x8x1xf32>
    %83 = vector.broadcast %82 : vector<4x8x1xf32> to vector<4x8x8xf32>
    %84 = arith.mulf %79, %83 : vector<4x8x8xf32>
    "tpu.trace_start"() <{level = 10 : i32, message = "hqk,hkd->hqd"}> : () -> ()
    %cst_16 = arith.constant dense<0.000000e+00> : vector<4x8x8xf32>
    %85 = tpu.matmul %84, %73, %cst_16 {dimension_numbers = #tpu.dot_dimension_numbers<[2], [1], [1], [2], [0, 0, 0, 1, 1, 2], [0], [0]>} : vector<4x8x8xf32>, vector<4x8x8xf32>, vector<4x8x8xf32> -> vector<4x8x8xf32>
    "tpu.trace_stop"() : () -> ()
    %86 = tpu.transpose %85, [1, 0, 2] : vector<4x8x8xf32> -> vector<8x4x8xf32>
    %87 = vector.shape_cast %86 : vector<8x4x8xf32> to vector<8x32xf32>
    %c0_17 = arith.constant 0 : index
    %c0_18 = arith.constant 0 : index
    %c0_19 = arith.constant 0 : index
    %88 = vector.load %arg4[%c0_17, %c0_18, %c0_19] : memref<2x128x64xf32, #tpu.memory_space<vmem>>, vector<1x32x32xf32>
    %89 = vector.shape_cast %88 : vector<1x32x32xf32> to vector<32x32xf32>
    %cst_20 = arith.constant dense<0.000000e+00> : vector<8x32xf32>
    %90 = tpu.matmul %87, %89, %cst_20 {dimension_numbers = #tpu.dot_dimension_numbers<[1], [0], [0], [1], [0, 0, 1, 1], [], []>} : vector<8x32xf32>, vector<32x32xf32>, vector<8x32xf32> -> vector<8x32xf32>
    %c0_21 = arith.constant 0 : index
    %c1_22 = arith.constant 1 : index
    %c0_23 = arith.constant 0 : index
    %91 = vector.load %arg5[%c0_21, %c1_22, %c0_23] : memref<2x8x96xf32, #tpu.memory_space<vmem>>, vector<1x1x32xf32>
    %92 = vector.shape_cast %91 : vector<1x1x32xf32> to vector<1x32xf32>
    %93 = vector.broadcast %92 : vector<1x32xf32> to vector<8x32xf32>
    %94 = arith.addf %90, %93 : vector<8x32xf32>
    %c0_24 = arith.constant 0 : index
    %c2_25 = arith.constant 2 : index
    %c0_26 = arith.constant 0 : index
    %95 = vector.load %arg5[%c0_24, %c2_25, %c0_26] : memref<2x8x96xf32, #tpu.memory_space<vmem>>, vector<1x1x32xf32>
    %96 = vector.shape_cast %95 : vector<1x1x32xf32> to vector<1x32xf32>
    %c0_27 = arith.constant 0 : index
    %c3_28 = arith.constant 3 : index
    %c0_29 = arith.constant 0 : index
    %97 = vector.load %arg5[%c0_27, %c3_28, %c0_29] : memref<2x8x96xf32, #tpu.memory_space<vmem>>, vector<1x1x32xf32>
    %98 = vector.shape_cast %97 : vector<1x1x32xf32> to vector<1x32xf32>
    %cst_30 = arith.constant dense<0.000000e+00> : vector<8xf32>
    %99 = vector.multi_reduction <add>, %94, %cst_30 [1] : vector<8x32xf32> to vector<8xf32>
    %100 = vector.shape_cast %99 : vector<8xf32> to vector<8x1xf32>
    %cst_31 = arith.constant 3.200000e+01 : f32
    %101 = vector.broadcast %cst_31 : f32 to vector<8x1xf32>
    %102 = arith.divf %100, %101 : vector<8x1xf32>
    %103 = vector.broadcast %102 : vector<8x1xf32> to vector<8x32xf32>
    %104 = arith.subf %94, %103 : vector<8x32xf32>
    %105 = arith.mulf %104, %104 : vector<8x32xf32>
    %cst_32 = arith.constant dense<0.000000e+00> : vector<8xf32>
    %106 = vector.multi_reduction <add>, %105, %cst_32 [1] : vector<8x32xf32> to vector<8xf32>
    %107 = vector.shape_cast %106 : vector<8xf32> to vector<8x1xf32>
    %cst_33 = arith.constant 3.200000e+01 : f32
    %108 = vector.broadcast %cst_33 : f32 to vector<8x1xf32>
    %109 = arith.divf %107, %108 : vector<8x1xf32>
    %cst_34 = arith.constant 9.99999974E-6 : f32
    %110 = vector.broadcast %cst_34 : f32 to vector<8x1xf32>
    %111 = arith.addf %109, %110 : vector<8x1xf32>
    %112 = math.rsqrt %111 : vector<8x1xf32>
    %113 = vector.broadcast %112 : vector<8x1xf32> to vector<8x32xf32>
    %114 = arith.mulf %104, %113 : vector<8x32xf32>
    %115 = vector.broadcast %96 : vector<1x32xf32> to vector<8x32xf32>
    %116 = arith.mulf %114, %115 : vector<8x32xf32>
    %117 = vector.broadcast %98 : vector<1x32xf32> to vector<8x32xf32>
    %118 = arith.addf %116, %117 : vector<8x32xf32>
    %119 = arith.addf %55, %118 : vector<8x32xf32>
    %c0_35 = arith.constant 0 : index
    %c32_36 = arith.constant 32 : index
    %c0_37 = arith.constant 0 : index
    %120 = vector.load %arg4[%c0_35, %c32_36, %c0_37] : memref<2x128x64xf32, #tpu.memory_space<vmem>>, vector<1x32x64xf32>
    %121 = vector.shape_cast %120 : vector<1x32x64xf32> to vector<32x64xf32>
    %c0_38 = arith.constant 0 : index
    %c64 = arith.constant 64 : index
    %c0_39 = arith.constant 0 : index
    %122 = vector.load %arg4[%c0_38, %c64, %c0_39] : memref<2x128x64xf32, #tpu.memory_space<vmem>>, vector<1x64x32xf32>
    %123 = vector.shape_cast %122 : vector<1x64x32xf32> to vector<64x32xf32>
    %cst_40 = arith.constant dense<0.000000e+00> : vector<8x64xf32>
    %124 = tpu.matmul %119, %121, %cst_40 {dimension_numbers = #tpu.dot_dimension_numbers<[1], [0], [0], [1], [0, 0, 1, 1], [], []>} : vector<8x32xf32>, vector<32x64xf32>, vector<8x64xf32> -> vector<8x64xf32>
    %c0_41 = arith.constant 0 : index
    %c4_42 = arith.constant 4 : index
    %c0_43 = arith.constant 0 : index
    %125 = vector.load %arg5[%c0_41, %c4_42, %c0_43] : memref<2x8x96xf32, #tpu.memory_space<vmem>>, vector<1x1x64xf32>
    %126 = vector.shape_cast %125 : vector<1x1x64xf32> to vector<1x64xf32>
    %127 = vector.broadcast %126 : vector<1x64xf32> to vector<8x64xf32>
    %128 = arith.addf %124, %127 : vector<8x64xf32>
    %cst_44 = arith.constant 0.000000e+00 : f32
    %129 = vector.broadcast %cst_44 : f32 to vector<8x64xf32>
    %130 = arith.maximumf %128, %129 : vector<8x64xf32>
    %cst_45 = arith.constant dense<0.000000e+00> : vector<8x32xf32>
    %131 = tpu.matmul %130, %123, %cst_45 {dimension_numbers = #tpu.dot_dimension_numbers<[1], [0], [0], [1], [0, 0, 1, 1], [], []>} : vector<8x64xf32>, vector<64x32xf32>, vector<8x32xf32> -> vector<8x32xf32>
    %c0_46 = arith.constant 0 : index
    %c5_47 = arith.constant 5 : index
    %c0_48 = arith.constant 0 : index
    %132 = vector.load %arg5[%c0_46, %c5_47, %c0_48] : memref<2x8x96xf32, #tpu.memory_space<vmem>>, vector<1x1x32xf32>
    %133 = vector.shape_cast %132 : vector<1x1x32xf32> to vector<1x32xf32>
    %134 = vector.broadcast %133 : vector<1x32xf32> to vector<8x32xf32>
    %135 = arith.addf %131, %134 : vector<8x32xf32>
    %c0_49 = arith.constant 0 : index
    %c6_50 = arith.constant 6 : index
    %c0_51 = arith.constant 0 : index
    %136 = vector.load %arg5[%c0_49, %c6_50, %c0_51] : memref<2x8x96xf32, #tpu.memory_space<vmem>>, vector<1x1x32xf32>
    %137 = vector.shape_cast %136 : vector<1x1x32xf32> to vector<1x32xf32>
    %c0_52 = arith.constant 0 : index
    %c7_53 = arith.constant 7 : index
    %c0_54 = arith.constant 0 : index
    %138 = vector.load %arg5[%c0_52, %c7_53, %c0_54] : memref<2x8x96xf32, #tpu.memory_space<vmem>>, vector<1x1x32xf32>
    %139 = vector.shape_cast %138 : vector<1x1x32xf32> to vector<1x32xf32>
    %cst_55 = arith.constant dense<0.000000e+00> : vector<8xf32>
    %140 = vector.multi_reduction <add>, %135, %cst_55 [1] : vector<8x32xf32> to vector<8xf32>
    %141 = vector.shape_cast %140 : vector<8xf32> to vector<8x1xf32>
    %cst_56 = arith.constant 3.200000e+01 : f32
    %142 = vector.broadcast %cst_56 : f32 to vector<8x1xf32>
    %143 = arith.divf %141, %142 : vector<8x1xf32>
    %144 = vector.broadcast %143 : vector<8x1xf32> to vector<8x32xf32>
    %145 = arith.subf %135, %144 : vector<8x32xf32>
    %146 = arith.mulf %145, %145 : vector<8x32xf32>
    %cst_57 = arith.constant dense<0.000000e+00> : vector<8xf32>
    %147 = vector.multi_reduction <add>, %146, %cst_57 [1] : vector<8x32xf32> to vector<8xf32>
    %148 = vector.shape_cast %147 : vector<8xf32> to vector<8x1xf32>
    %cst_58 = arith.constant 3.200000e+01 : f32
    %149 = vector.broadcast %cst_58 : f32 to vector<8x1xf32>
    %150 = arith.divf %148, %149 : vector<8x1xf32>
    %cst_59 = arith.constant 9.99999974E-6 : f32
    %151 = vector.broadcast %cst_59 : f32 to vector<8x1xf32>
    %152 = arith.addf %150, %151 : vector<8x1xf32>
    %153 = math.rsqrt %152 : vector<8x1xf32>
    %154 = vector.broadcast %153 : vector<8x1xf32> to vector<8x32xf32>
    %155 = arith.mulf %145, %154 : vector<8x32xf32>
    %156 = vector.broadcast %137 : vector<1x32xf32> to vector<8x32xf32>
    %157 = arith.mulf %155, %156 : vector<8x32xf32>
    %158 = vector.broadcast %139 : vector<1x32xf32> to vector<8x32xf32>
    %159 = arith.addf %157, %158 : vector<8x32xf32>
    %160 = arith.addf %119, %159 : vector<8x32xf32>
    %cst_60 = arith.constant dense<0.000000e+00> : vector<8x128xf32>
    %161 = tpu.matmul %160, %56, %cst_60 {dimension_numbers = #tpu.dot_dimension_numbers<[1], [0], [0], [1], [0, 0, 1, 1], [], []>} : vector<8x32xf32>, vector<32x128xf32>, vector<8x128xf32> -> vector<8x128xf32>
    %162 = vector.broadcast %57 : vector<1x128xf32> to vector<8x128xf32>
    %163 = arith.addf %161, %162 : vector<8x128xf32>
    %c0_61 = arith.constant 0 : index
    %c0_62 = arith.constant 0 : index
    %c0_63 = arith.constant 0 : index
    %c0_64 = arith.constant 0 : index
    %164 = vector.load %arg7[%c0_61, %c0_62, %c0_63, %c0_64] : memref<1x2x8x128xf32, #tpu.memory_space<vmem>>, vector<1x1x8x128xf32>
    %165 = vector.shape_cast %164 : vector<1x1x8x128xf32> to vector<8x128xf32>
    %166 = vector.shape_cast %163 : vector<8x128xf32> to vector<1x1x8x128xf32>
    tpu.vector_store %arg7[%c0_61, %c0_62, %c0_63, %c0_64], %166 {strides = array<i32>} : memref<1x2x8x128xf32, #tpu.memory_space<vmem>>, vector<1x1x8x128xf32>,
    %c1_65 = arith.constant 1 : index
    %c0_66 = arith.constant 0 : index
    %c0_67 = arith.constant 0 : index
    %167 = vector.load %arg3[%c1_65, %c0_66, %c0_67] : memref<2x32x96xf32, #tpu.memory_space<vmem>>, vector<1x32x96xf32>
    %168 = vector.shape_cast %167 : vector<1x32x96xf32> to vector<32x96xf32>
    %cst_68 = arith.constant dense<0.000000e+00> : vector<8x96xf32>
    %169 = tpu.matmul %119, %168, %cst_68 {dimension_numbers = #tpu.dot_dimension_numbers<[1], [0], [0], [1], [0, 0, 1, 1], [], []>} : vector<8x32xf32>, vector<32x96xf32>, vector<8x96xf32> -> vector<8x96xf32>
    %c1_69 = arith.constant 1 : index
    %c0_70 = arith.constant 0 : index
    %c0_71 = arith.constant 0 : index
    %170 = vector.load %arg5[%c1_69, %c0_70, %c0_71] : memref<2x8x96xf32, #tpu.memory_space<vmem>>, vector<1x1x96xf32>
    %171 = vector.shape_cast %170 : vector<1x1x96xf32> to vector<1x96xf32>
    %172 = vector.broadcast %171 : vector<1x96xf32> to vector<8x96xf32>
    %173 = arith.addf %169, %172 : vector<8x96xf32>
    %174 = vector.extract_strided_slice %173 {offsets = [0, 0], sizes = [8, 32], strides = [1, 1]} : vector<8x96xf32> to vector<8x32xf32>
    %175 = vector.shape_cast %174 : vector<8x32xf32> to vector<8x4x8xf32>
    %176 = tpu.transpose %175, [1, 0, 2] : vector<8x4x8xf32> -> vector<4x8x8xf32>
    %177 = vector.extract_strided_slice %173 {offsets = [0, 32], sizes = [8, 32], strides = [1, 1]} : vector<8x96xf32> to vector<8x32xf32>
    %178 = vector.shape_cast %177 : vector<8x32xf32> to vector<8x4x8xf32>
    %179 = tpu.transpose %178, [1, 0, 2] : vector<8x4x8xf32> -> vector<4x8x8xf32>
    %180 = vector.extract_strided_slice %173 {offsets = [0, 64], sizes = [8, 32], strides = [1, 1]} : vector<8x96xf32> to vector<8x32xf32>
    %181 = vector.shape_cast %180 : vector<8x32xf32> to vector<8x4x8xf32>
    %182 = tpu.transpose %181, [1, 0, 2] : vector<8x4x8xf32> -> vector<4x8x8xf32>
    "tpu.trace_start"() <{level = 10 : i32, message = "hqd,hkd->hqk"}> : () -> ()
    %cst_72 = arith.constant dense<0.000000e+00> : vector<4x8x8xf32>
    %183 = tpu.matmul %176, %179, %cst_72 {dimension_numbers = #tpu.dot_dimension_numbers<[2], [2], [1], [1], [0, 0, 0, 1, 1, 1], [0], [0]>} : vector<4x8x8xf32>, vector<4x8x8xf32>, vector<4x8x8xf32> -> vector<4x8x8xf32>
    "tpu.trace_stop"() : () -> ()
    %cst_73 = arith.constant dense<0xFF800000> : vector<4x8xf32>
    %184 = vector.multi_reduction <maximumf>, %183, %cst_73 [2] : vector<4x8x8xf32> to vector<4x8xf32>
    %185 = vector.shape_cast %184 : vector<4x8xf32> to vector<4x8x1xf32>
    %186 = vector.broadcast %185 : vector<4x8x1xf32> to vector<4x8x8xf32>
    %187 = arith.subf %183, %186 : vector<4x8x8xf32>
    %188 = math.exp %187 : vector<4x8x8xf32>
    %cst_74 = arith.constant dense<0.000000e+00> : vector<4x8xf32>
    %189 = vector.multi_reduction <add>, %188, %cst_74 [2] : vector<4x8x8xf32> to vector<4x8xf32>
    %190 = vector.shape_cast %189 : vector<4x8xf32> to vector<4x8x1xf32>
    %191 = tpu.reciprocal %190 {approx = true} : vector<4x8x1xf32> -> vector<4x8x1xf32>
    %192 = vector.broadcast %191 : vector<4x8x1xf32> to vector<4x8x8xf32>
    %193 = arith.mulf %188, %192 : vector<4x8x8xf32>
    "tpu.trace_start"() <{level = 10 : i32, message = "hqk,hkd->hqd"}> : () -> ()
    %cst_75 = arith.constant dense<0.000000e+00> : vector<4x8x8xf32>
    %194 = tpu.matmul %193, %182, %cst_75 {dimension_numbers = #tpu.dot_dimension_numbers<[2], [1], [1], [2], [0, 0, 0, 1, 1, 2], [0], [0]>} : vector<4x8x8xf32>, vector<4x8x8xf32>, vector<4x8x8xf32> -> vector<4x8x8xf32>
    "tpu.trace_stop"() : () -> ()
    %195 = tpu.transpose %194, [1, 0, 2] : vector<4x8x8xf32> -> vector<8x4x8xf32>
    %196 = vector.shape_cast %195 : vector<8x4x8xf32> to vector<8x32xf32>
    %c1_76 = arith.constant 1 : index
    %c0_77 = arith.constant 0 : index
    %c0_78 = arith.constant 0 : index
    %197 = vector.load %arg4[%c1_76, %c0_77, %c0_78] : memref<2x128x64xf32, #tpu.memory_space<vmem>>, vector<1x32x32xf32>
    %198 = vector.shape_cast %197 : vector<1x32x32xf32> to vector<32x32xf32>
    %cst_79 = arith.constant dense<0.000000e+00> : vector<8x32xf32>
    %199 = tpu.matmul %196, %198, %cst_79 {dimension_numbers = #tpu.dot_dimension_numbers<[1], [0], [0], [1], [0, 0, 1, 1], [], []>} : vector<8x32xf32>, vector<32x32xf32>, vector<8x32xf32> -> vector<8x32xf32>
    %c1_80 = arith.constant 1 : index
    %c1_81 = arith.constant 1 : index
    %c0_82 = arith.constant 0 : index
    %200 = vector.load %arg5[%c1_80, %c1_81, %c0_82] : memref<2x8x96xf32, #tpu.memory_space<vmem>>, vector<1x1x32xf32>
    %201 = vector.shape_cast %200 : vector<1x1x32xf32> to vector<1x32xf32>
    %202 = vector.broadcast %201 : vector<1x32xf32> to vector<8x32xf32>
    %203 = arith.addf %199, %202 : vector<8x32xf32>
    %c1_83 = arith.constant 1 : index
    %c2_84 = arith.constant 2 : index
    %c0_85 = arith.constant 0 : index
    %204 = vector.load %arg5[%c1_83, %c2_84, %c0_85] : memref<2x8x96xf32, #tpu.memory_space<vmem>>, vector<1x1x32xf32>
    %205 = vector.shape_cast %204 : vector<1x1x32xf32> to vector<1x32xf32>
    %c1_86 = arith.constant 1 : index
    %c3_87 = arith.constant 3 : index
    %c0_88 = arith.constant 0 : index
    %206 = vector.load %arg5[%c1_86, %c3_87, %c0_88] : memref<2x8x96xf32, #tpu.memory_space<vmem>>, vector<1x1x32xf32>
    %207 = vector.shape_cast %206 : vector<1x1x32xf32> to vector<1x32xf32>
    %cst_89 = arith.constant dense<0.000000e+00> : vector<8xf32>
    %208 = vector.multi_reduction <add>, %203, %cst_89 [1] : vector<8x32xf32> to vector<8xf32>
    %209 = vector.shape_cast %208 : vector<8xf32> to vector<8x1xf32>
    %cst_90 = arith.constant 3.200000e+01 : f32
    %210 = vector.broadcast %cst_90 : f32 to vector<8x1xf32>
    %211 = arith.divf %209, %210 : vector<8x1xf32>
    %212 = vector.broadcast %211 : vector<8x1xf32> to vector<8x32xf32>
    %213 = arith.subf %203, %212 : vector<8x32xf32>
    %214 = arith.mulf %213, %213 : vector<8x32xf32>
    %cst_91 = arith.constant dense<0.000000e+00> : vector<8xf32>
    %215 = vector.multi_reduction <add>, %214, %cst_91 [1] : vector<8x32xf32> to vector<8xf32>
    %216 = vector.shape_cast %215 : vector<8xf32> to vector<8x1xf32>
    %cst_92 = arith.constant 3.200000e+01 : f32
    %217 = vector.broadcast %cst_92 : f32 to vector<8x1xf32>
    %218 = arith.divf %216, %217 : vector<8x1xf32>
    %cst_93 = arith.constant 9.99999974E-6 : f32
    %219 = vector.broadcast %cst_93 : f32 to vector<8x1xf32>
    %220 = arith.addf %218, %219 : vector<8x1xf32>
    %221 = math.rsqrt %220 : vector<8x1xf32>
    %222 = vector.broadcast %221 : vector<8x1xf32> to vector<8x32xf32>
    %223 = arith.mulf %213, %222 : vector<8x32xf32>
    %224 = vector.broadcast %205 : vector<1x32xf32> to vector<8x32xf32>
    %225 = arith.mulf %223, %224 : vector<8x32xf32>
    %226 = vector.broadcast %207 : vector<1x32xf32> to vector<8x32xf32>
    %227 = arith.addf %225, %226 : vector<8x32xf32>
    %228 = arith.addf %119, %227 : vector<8x32xf32>
    %c1_94 = arith.constant 1 : index
    %c32_95 = arith.constant 32 : index
    %c0_96 = arith.constant 0 : index
    %229 = vector.load %arg4[%c1_94, %c32_95, %c0_96] : memref<2x128x64xf32, #tpu.memory_space<vmem>>, vector<1x32x64xf32>
    %230 = vector.shape_cast %229 : vector<1x32x64xf32> to vector<32x64xf32>
    %c1_97 = arith.constant 1 : index
    %c64_98 = arith.constant 64 : index
    %c0_99 = arith.constant 0 : index
    %231 = vector.load %arg4[%c1_97, %c64_98, %c0_99] : memref<2x128x64xf32, #tpu.memory_space<vmem>>, vector<1x64x32xf32>
    %232 = vector.shape_cast %231 : vector<1x64x32xf32> to vector<64x32xf32>
    %cst_100 = arith.constant dense<0.000000e+00> : vector<8x64xf32>
    %233 = tpu.matmul %228, %230, %cst_100 {dimension_numbers = #tpu.dot_dimension_numbers<[1], [0], [0], [1], [0, 0, 1, 1], [], []>} : vector<8x32xf32>, vector<32x64xf32>, vector<8x64xf32> -> vector<8x64xf32>
    %c1_101 = arith.constant 1 : index
    %c4_102 = arith.constant 4 : index
    %c0_103 = arith.constant 0 : index
    %234 = vector.load %arg5[%c1_101, %c4_102, %c0_103] : memref<2x8x96xf32, #tpu.memory_space<vmem>>, vector<1x1x64xf32>
    %235 = vector.shape_cast %234 : vector<1x1x64xf32> to vector<1x64xf32>
    %236 = vector.broadcast %235 : vector<1x64xf32> to vector<8x64xf32>
    %237 = arith.addf %233, %236 : vector<8x64xf32>
    %cst_104 = arith.constant 0.000000e+00 : f32
    %238 = vector.broadcast %cst_104 : f32 to vector<8x64xf32>
    %239 = arith.maximumf %237, %238 : vector<8x64xf32>
    %cst_105 = arith.constant dense<0.000000e+00> : vector<8x32xf32>
    %240 = tpu.matmul %239, %232, %cst_105 {dimension_numbers = #tpu.dot_dimension_numbers<[1], [0], [0], [1], [0, 0, 1, 1], [], []>} : vector<8x64xf32>, vector<64x32xf32>, vector<8x32xf32> -> vector<8x32xf32>
    %c1_106 = arith.constant 1 : index
    %c5_107 = arith.constant 5 : index
    %c0_108 = arith.constant 0 : index
    %241 = vector.load %arg5[%c1_106, %c5_107, %c0_108] : memref<2x8x96xf32, #tpu.memory_space<vmem>>, vector<1x1x32xf32>
    %242 = vector.shape_cast %241 : vector<1x1x32xf32> to vector<1x32xf32>
    %243 = vector.broadcast %242 : vector<1x32xf32> to vector<8x32xf32>
    %244 = arith.addf %240, %243 : vector<8x32xf32>
    %c1_109 = arith.constant 1 : index
    %c6_110 = arith.constant 6 : index
    %c0_111 = arith.constant 0 : index
    %245 = vector.load %arg5[%c1_109, %c6_110, %c0_111] : memref<2x8x96xf32, #tpu.memory_space<vmem>>, vector<1x1x32xf32>
    %246 = vector.shape_cast %245 : vector<1x1x32xf32> to vector<1x32xf32>
    %c1_112 = arith.constant 1 : index
    %c7_113 = arith.constant 7 : index
    %c0_114 = arith.constant 0 : index
    %247 = vector.load %arg5[%c1_112, %c7_113, %c0_114] : memref<2x8x96xf32, #tpu.memory_space<vmem>>, vector<1x1x32xf32>
    %248 = vector.shape_cast %247 : vector<1x1x32xf32> to vector<1x32xf32>
    %cst_115 = arith.constant dense<0.000000e+00> : vector<8xf32>
    %249 = vector.multi_reduction <add>, %244, %cst_115 [1] : vector<8x32xf32> to vector<8xf32>
    %250 = vector.shape_cast %249 : vector<8xf32> to vector<8x1xf32>
    %cst_116 = arith.constant 3.200000e+01 : f32
    %251 = vector.broadcast %cst_116 : f32 to vector<8x1xf32>
    %252 = arith.divf %250, %251 : vector<8x1xf32>
    %253 = vector.broadcast %252 : vector<8x1xf32> to vector<8x32xf32>
    %254 = arith.subf %244, %253 : vector<8x32xf32>
    %255 = arith.mulf %254, %254 : vector<8x32xf32>
    %cst_117 = arith.constant dense<0.000000e+00> : vector<8xf32>
    %256 = vector.multi_reduction <add>, %255, %cst_117 [1] : vector<8x32xf32> to vector<8xf32>
    %257 = vector.shape_cast %256 : vector<8xf32> to vector<8x1xf32>
    %cst_118 = arith.constant 3.200000e+01 : f32
    %258 = vector.broadcast %cst_118 : f32 to vector<8x1xf32>
    %259 = arith.divf %257, %258 : vector<8x1xf32>
    %cst_119 = arith.constant 9.99999974E-6 : f32
    %260 = vector.broadcast %cst_119 : f32 to vector<8x1xf32>
    %261 = arith.addf %259, %260 : vector<8x1xf32>
    %262 = math.rsqrt %261 : vector<8x1xf32>
    %263 = vector.broadcast %262 : vector<8x1xf32> to vector<8x32xf32>
    %264 = arith.mulf %254, %263 : vector<8x32xf32>
    %265 = vector.broadcast %246 : vector<1x32xf32> to vector<8x32xf32>
    %266 = arith.mulf %264, %265 : vector<8x32xf32>
    %267 = vector.broadcast %248 : vector<1x32xf32> to vector<8x32xf32>
    %268 = arith.addf %266, %267 : vector<8x32xf32>
    %269 = arith.addf %228, %268 : vector<8x32xf32>
    %cst_120 = arith.constant dense<0.000000e+00> : vector<8x128xf32>
    %270 = tpu.matmul %269, %56, %cst_120 {dimension_numbers = #tpu.dot_dimension_numbers<[1], [0], [0], [1], [0, 0, 1, 1], [], []>} : vector<8x32xf32>, vector<32x128xf32>, vector<8x128xf32> -> vector<8x128xf32>
    %271 = vector.broadcast %57 : vector<1x128xf32> to vector<8x128xf32>
    %272 = arith.addf %270, %271 : vector<8x128xf32>
    %c0_121 = arith.constant 0 : index
    %c1_122 = arith.constant 1 : index
    %c0_123 = arith.constant 0 : index
    %c0_124 = arith.constant 0 : index
    %273 = vector.load %arg7[%c0_121, %c1_122, %c0_123, %c0_124] : memref<1x2x8x128xf32, #tpu.memory_space<vmem>>, vector<1x1x8x128xf32>
    %274 = vector.shape_cast %273 : vector<1x1x8x128xf32> to vector<8x128xf32>
    %275 = vector.shape_cast %272 : vector<8x128xf32> to vector<1x1x8x128xf32>
    tpu.vector_store %arg7[%c0_121, %c1_122, %c0_123, %c0_124], %275 {strides = array<i32>} : memref<1x2x8x128xf32, #tpu.memory_space<vmem>>, vector<1x1x8x128xf32>,
    return
  }
  func.func @transform_0(%arg0: i32, %arg1: memref<2x8xi32, #tpu.memory_space<smem>>) -> (i32, i32) {
    %c0_i32 = arith.constant 0 : i32
    %c0_i32_0 = arith.constant 0 : i32
    %c0_i32_1 = arith.constant 0 : i32
    return %c0_i32, %c0_i32_0 : i32, i32
  }
  func.func @transform_1(%arg0: i32, %arg1: memref<2x8xi32, #tpu.memory_space<smem>>) -> (i32, i32, i32) {
    %c0_i32 = arith.constant 0 : i32
    %c0_i32_0 = arith.constant 0 : i32
    %c0_i32_1 = arith.constant 0 : i32
    %c0_i32_2 = arith.constant 0 : i32
    return %c0_i32, %c0_i32_0, %c0_i32_1 : i32, i32, i32
  }
  func.func @transform_2(%arg0: i32, %arg1: memref<2x8xi32, #tpu.memory_space<smem>>) -> (i32, i32, i32) {
    %c0_i32 = arith.constant 0 : i32
    %c0_i32_0 = arith.constant 0 : i32
    %c0_i32_1 = arith.constant 0 : i32
    %c0_i32_2 = arith.constant 0 : i32
    return %c0_i32, %c0_i32_0, %c0_i32_1 : i32, i32, i32
  }
  func.func @transform_3(%arg0: i32, %arg1: memref<2x8xi32, #tpu.memory_space<smem>>) -> (i32, i32, i32) {
    %c0_i32 = arith.constant 0 : i32
    %c0_i32_0 = arith.constant 0 : i32
    %c0_i32_1 = arith.constant 0 : i32
    %c0_i32_2 = arith.constant 0 : i32
    return %c0_i32, %c0_i32_0, %c0_i32_1 : i32, i32, i32
  }
  func.func @transform_4(%arg0: i32, %arg1: memref<2x8xi32, #tpu.memory_space<smem>>) -> (i32, i32) {
    %c0_i32 = arith.constant 0 : i32
    %c0_i32_0 = arith.constant 0 : i32
    %c0_i32_1 = arith.constant 0 : i32
    return %c0_i32, %c0_i32_0 : i32, i32
  }
  func.func @transform_5(%arg0: i32, %arg1: memref<2x8xi32, #tpu.memory_space<smem>>) -> (i32, i32, i32, i32) {
    %c0_i32 = arith.constant 0 : i32
    %c0_i32_0 = arith.constant 0 : i32
    %c0_i32_1 = arith.constant 0 : i32
    %c0_i32_2 = arith.constant 0 : i32
    return %arg0, %c0_i32, %c0_i32_0, %c0_i32_1 : i32, i32, i32, i32
  }
}

</mosaic_0001>

<bundles_post_ra>
// kernel: forward.1
= control target key start
LH: loop header
LB: loop body
LE: loop exit
PB: predicated region body
PF: predicated region fallthrough
CT: control target
= control target key end

     0   :  { %s2445_s24 = smov [#allocation3]   ;;  %s3345_s0 = inlined_call_operand.vmem [shape: s32[2,8], index: 0, kind: input, shape index: {}]   ;;  %s3346_s1 = inlined_call_operand.vmem [shape: f32[136,32], index: 1, kind: input, shape index: {}]   ;;  %s3347_s2 = inlined_call_operand.vmem [shape: f32[2,32,96], index: 2, kind: input, shape index: {}]   ;;  %s3348_s3 = inlined_call_operand.vmem [shape: f32[2,128,64], index: 3, kind: input, shape index: {}]   ;;  %s3349_s4 = inlined_call_operand.vmem [shape: f32[2,8,96], index: 4, kind: input, shape index: {}]   ;;  %s3350_s5 = inlined_call_operand.vmem [shape: f32[33,128], index: 5, kind: input, shape index: {}]   ;;  %s3351_s6 = inlined_call_operand.vmem [shape: f32[2,2,8,128], index: 6, kind: output, shape index: {}]  }
   0x1   :  { %s12_s23 = sshll.u32 %s3345_s0, 4  ;;  %s13_s23 = int_to_ptr.vmem [resolvable:$true] %s12_s23 }
   0x2   :  { %15 = dma.vmem_to_smem %s13_s23, 32, %s2445_s24, [#allocation2] }
   0x3   :  { %2439 = dma.done.wait [#allocation2], 32 }
   0x4   :  { %2440 = vsyncadd [#allocation2], 4294967264 }
   0x5   :  { %18 = sfence }
   0x6   :  { %s2496_s25 = smov 0  }
   0x7 LB: > { %s2502_s26 = sadd.s32 4294967295, %s2443_s25   ;;  %p2245_p0 = scmp.ge.s32.totalorder %s2443_s25, 1  ;;  %s2443_s25 = sphi %s2496_s25, %s24_s25  }
   0x8   : > { %p186_p1 = scmp.lt.s32.totalorder %s2443_s25, 3 }
   0xa   : > { %p187_p2 = pnand %p2245_p0, %p186_p1 }
   0xb   : > { %s2513_s30 = sshll.u32 (!%p187_p2), %s2502_s26, 7  ;;  %s2447_s16 = smov (!%p187_p2), 104  }
   0xc   : > { %190 = sbr.rel (%p187_p2) target bundleno = 3922 (0xf52), region = 40  ;;  %s217_s7 = sld [smem:[#allocation3 + %s2513_s30]] (!%p187_p2) }
   0xd   : > { %s222_s8 = sadd.s32 (!%p187_p2), 1, %s2513_s30  ;;  %s228_s12 = sadd.s32 (!%p187_p2), 2, %s2513_s30 }
   0xe   : > { %s223_s11 = sld [smem:[#allocation3 + %s222_s8]] (!%p187_p2)  ;;  %s234_s14 = sadd.s32 (!%p187_p2), 3, %s2513_s30 }
   0xf   : > { %s2521_s13 = sld [smem:[#allocation3 + %s228_s12]] (!%p187_p2)  ;;  %s240_s18 = sadd.s32 (!%p187_p2), 4, %s2513_s30 }
  0x10   : > { %s2529_s17 = sld [smem:[#allocation3 + %s234_s14]] (!%p187_p2)  ;;  %s246_s20 = sadd.s32 (!%p187_p2), 5, %s2513_s30 }
  0x11   : > { %v293_v0 = vld [vmem:[%s3346_s1 + $0x78] sm:$0xff]  ;;  %v292_v1 = vld [vmem:[%s3346_s1 + $0x70] sm:$0xff]  ;;  %v214_v2 = vlaneseq  ;;  %v291_v3 = vld [vmem:[%s3346_s1 + $0x68] sm:$0xff]  ;;  %s2532_s19 = sld [smem:[#allocation3 + %s240_s18]]  ;;  %s252_s24 = sadd.s32 6, %s2513_s30  ;;  %vm264_vm0 = vcmask 1040384  }
  0x12   : > { %295 = vmatpush.msra.mxu0 %v293_v0  ;;  %v290_v4 = vld [vmem:[%s3346_s1 + $0x60] sm:$0xff]  ;;  %v289_v6 = vld [vmem:[%s3346_s1 + $0x58] sm:$0xff]  ;;  %s2538_s23 = sld [smem:[#allocation3 + %s246_s20]]  ;;  %v322_v8 = vld [vmem:[%s3347_s2 + $0x10] sm:$0xff]  ;;  %v218_v10 = vstv %s217_s7  ;;  %vm266_vm2 = vcmask 1041408   ;;  %v2446_v12 = vmov 0.0  }
  0x13   : > { %v2527_v5 = vand.u32 127, %v214_v2  ;;  %v323_v7 = vld [vmem:[%s3347_s2 + $0x18] sm:$0xff]  ;;  %v288_v9 = vld [vmem:[%s3346_s1 + $0x50] sm:$0xff]  ;;  %s2551_s10 = sld [smem:[#allocation3 + %s252_s24]]  ;;  %s258_s12 = sadd.s32 7, %s2513_s30  ;;  %v287_v15 = vld [vmem:[%s3346_s1 + $0x48] sm:$0xff] }
  0x14   : > { %296 = vmatpush.msra.mxu0 %v292_v1  ;;  %342 = vmatpush.msra.mxu1 %v323_v7  ;;  %v224_v11 = vstv %s223_s11  ;;  %v286_v21 = vld [vmem:[%s3346_s1 + $0x40] sm:$0xff]  ;;  %s259_s30 = sld [smem:[#allocation3 + %s258_s12]]  ;;  %vm268_vm6 = vcmask 1042432   ;;  %v285_v22 = vld [vmem:[%s3346_s1 + $0x38] sm:$0xff]  ;;  %v284_v26 = vld [vmem:[%s3346_s1 + $0x30] sm:$0xff]  ;;  %vm270_vm8 = vcmask 1043456  }
  0x15   : > { %vm219_vm1 = vcmp.eq.s32.totalorder %v2527_v5, %v218_v10  ;;  %vm225_vm3 = vcmp.eq.s32.totalorder %v2527_v5, %v224_v11  ;;  %v230_v14 = vstv %s2521_s13  ;;  %v283_v30 = vld [vmem:[%s3346_s1 + $0x28] sm:$0xff]  ;;  %vm272_vm10 = vcmask 1044480   ;;  %v282_v31 = vld [vmem:[%s3346_s1 + $0x20] sm:$0xff]  ;;  %v281_v35 = vld [vmem:[%s3346_s1 + $0x18] sm:$0xff]  ;;  %s2449_s18 = smov 96   ;;  %s2453_s20 = smov 64  }
  0x16   : > { %297 = vmatpush.msra.mxu0 %v291_v3  ;;  %v2249_v13 = vsel %vm219_vm1, 1.0, %v2446_v12  ;;  %343 = vmatpush.msra.mxu1 %v322_v8  ;;  %v2250_v16 = vsel %vm225_vm3, 1.0, %v2446_v12  ;;  %vm231_vm4 = vcmp.eq.s32.totalorder %v2527_v5, %v230_v14  ;;  %v236_v17 = vstv %s2529_s17  ;;  %v280_v38 = vld [vmem:[%s3346_s1 + $0x10] sm:$0xff]  ;;  %v279_v39 = vld [vmem:[%s3346_s1 + $0x8] sm:$0xff]  ;;  %v278_v42 = vld [vmem:[%s3346_s1] sm:$0xff]  ;;  %s2448_s17 = smov 120  }
  0x17   : > { %v2251_v18 = vsel %vm231_vm4, 1.0, %v2446_v12  ;;  %vm237_vm5 = vcmp.eq.s32.totalorder %v2527_v5, %v236_v17  ;;  %v242_v19 = vstv %s2532_s19  ;;  %v265_v20 = vsel %vm264_vm0, %v2249_v13, %v2250_v16  ;;  %v321_v44 = vld [vmem:[%s3347_s2 + $0x8] sm:$0xff]  ;;  %v320_v45 = vld [vmem:[%s3347_s2] sm:$0xff]  ;;  %s2450_s19 = smov 112   ;;  %s2454_s21 = smov 16  }
  0x18   : > { %298 = vmatpush.msra.mxu0 %v290_v4  ;;  %v2252_v23 = vsel %vm237_vm5, 1.0, %v2446_v12  ;;  %vm243_vm7 = vcmp.eq.s32.totalorder %v2527_v5, %v242_v19  ;;  %v248_v24 = vstv %s2538_s23  ;;  %v267_v25 = vsel %vm266_vm2, %v265_v20, %v2251_v18  ;;  %344 = vmatpush.msra.mxu1 %v321_v44  ;;  %v294_v46 = vld [vmem:[%s3346_s1 + $0x80] sm:$0xff]  ;;  %s2455_s22 = smov 8   ;;  %s2456_s23 = smov 24  }
  0x19   : > { %v2253_v27 = vsel %vm243_vm7, 1.0, %v2446_v12  ;;  %vm249_vm9 = vcmp.eq.s32.totalorder %v2527_v5, %v248_v24  ;;  %v254_v28 = vstv %s2551_s10  ;;  %v269_v29 = vsel %vm268_vm6, %v267_v25, %v2252_v23  ;;  %v2364_v49 = vld [vmem:[%s3349_s4] ss:$0 sm:$0xff]  ;;  %p209_p3 = scmp.lt.s32.totalorder %s2502_s26, 1 }
  0x1a   : > { %299 = vmatpush.msra.mxu0 %v289_v6  ;;  %v2254_v32 = vsel %vm249_vm9, 1.0, %v2446_v12  ;;  %vm255_vm11 = vcmp.eq.s32.totalorder %v2527_v5, %v254_v28  ;;  %v260_v33 = vstv %s259_s30  ;;  %v271_v34 = vsel %vm270_vm8, %v269_v29, %v2253_v27  ;;  %345 = vmatpush.msra.mxu1 %v320_v45 }
  0x1b   : > { %v2255_v36 = vsel %vm255_vm11, 1.0, %v2446_v12  ;;  %vm261_vm12 = vcmp.eq.s32.totalorder %v2527_v5, %v260_v33  ;;  %v273_v37 = vsel %vm272_vm10, %v271_v34, %v2254_v32  ;;  %vm274_vm13 = vcmask 1045504   ;;  %s3353_s26 = smov (!%p209_p3, %s2502_s26), 1 }
  0x1c   : > { %300 = vmatpush.msra.mxu0 %v288_v9  ;;  %v2256_v40 = vsel %vm261_vm12, 1.0, %v2446_v12  ;;  %v275_v41 = vsel %vm274_vm13, %v273_v37, %v2255_v36  ;;  %vm276_vm14 = vcmask 1046528   ;;  %vm326_vm15 = vcmask 261120   ;;  %s2322_s24 = sshll.u32 %s3353_s26, 4 }
  0x1d   : > { %v277_v43 = vsel %vm276_vm14, %v275_v41, %v2256_v40  ;;  %v2451_v52 = vmov 1983009808   ;;  %vm361_vm0 = vcmask 1047556   ;;  %v2452_v61 = vmov 1934713408   ;;  %s3130_s8 = scalar_lea.vmem %s3351_s6, %s2322_s24 }
  0x1e   : > { %301 = vmatpush.msra.mxu0 %v287_v15  ;;  %v366_v53 = vunpack.c.l.s4 %v2451_v52  ;;  %v390_v62 = vunpack.c.l.s4 %v2452_v61  ;;  %vm715_vm1 = vcmask 64512   ;;  %vm1079_vm2 = vcmask 130048  }
  0x1f   : > { %vm1081_vm3 = vcmask 195584   ;;  %vm1188_vm8 = vcmask 523264  }
  0x20   : > { %302 = vmatpush.msra.mxu0 %v286_v21  ;;  %v2634_v58 = vunpack.c.0.s8 %v366_v53  ;;  %v2645_v3 = vunpack.c.0.s8 %v390_v62 }
  0x22   : > { %303 = vmatpush.msra.mxu0 %v285_v22 }
  0x24   : > { %304 = vmatpush.msra.mxu0 %v284_v26 }
  0x26   : > { %305 = vmatpush.msra.mxu0 %v283_v30 }
  0x28   : > { %306 = vmatpush.msra.mxu0 %v282_v31 }
  0x2a   : > { %307 = vmatpush.msra.mxu0 %v281_v35 }
  0x2c   : > { %308 = vmatpush.msra.mxu0 %v280_v38 }
  0x2e   : > { %309 = vmatpush.msra.mxu0 %v279_v39 }
  0x30   : > { %310 = vmatpush.msra.mxu0 %v278_v42 }
  0x31   : > { %311 = vmatmul.f32.vlgmr.msra.gmra.mxu0 %v277_v43 }
  0xae   : > { %v312_v47 = vpop.f32.mrf.mxu0 }
  0xaf   : > { %v2607_v48 = vadd.f32 %v312_v47, %v294_v46 }
  0xb1   : > { %2257 = vmatmul.msk.f32.vlgmr.msra.gmra.mxu1 %vm326_vm15, %v2607_v48 }
 0x12e   : > { %v347_v50 = vpop.f32.mrf.mxu1 }
 0x12f   : > { %v2614_v51 = vadd.f32 %v2364_v49, %v347_v50 }
 0x131   : > { %357 = vrot.lane.b32.xlu1 %v2614_v51, %s2447_s16  ;;  %351 = vrot.lane.b32.xlu0 %v2614_v51, %s2448_s17  ;;  %v363_v0 = vrot.slane %v2614_v51, 4 }
 0x139   : > { %471 = vrot.lane.b32.xlu1 %v2614_v51, %s2449_s18  ;;  %354 = vrot.lane.b32.xlu0 %v2614_v51, %s2450_s19 }
 0x1a3   : > { %v2624_v54 = vpop.permute.xlu1 %357  ;;  %v2626_v55 = vpop.permute.xlu0 %351 }
 0x1a4   : > { %v373_v56 = vrot.slane %v2624_v54, 4  ;;  %v375_v57 = vrot.slane %v2626_v55, 4  ;;  %477 = vrot.lane.b32.xlu0 %v2624_v54, %s2449_s18  ;;  %473 = vrot.lane.b32.xlu2 %v2626_v55, %s2449_s18 }
 0x1a6   : > { %v374_v59 = vsel %vm361_vm0, %v373_v56, %v2626_v55  ;;  %v376_v60 = vsel %vm361_vm0, %v2624_v54, %v375_v57 }
 0x1a7   : > { %v384_v63 = vperm.slane %v376_v60, %v2634_v58  ;;  %v380_v1 = vperm.slane %v374_v59, %v2634_v58 }
 0x1a9   : > { %v397_v6 = vrot.slane %v384_v63, 4  ;;  %v385_v9 = vrot.slane %v380_v1, 4 }
 0x1ab   : > { %v2643_v2 = vpop.permute.xlu0 %354 }
 0x1ac   : > { %v360_v4 = vrot.slane %v2643_v2, 4  ;;  %v364_v5 = vsel %vm361_vm0, %v2643_v2, %v363_v0  ;;  %475 = vrot.lane.b32.xlu2 %v2643_v2, %s2449_s18 }
 0x1ad   : > { %v372_v7 = vperm.slane %v364_v5, %v2634_v58 }
 0x1ae   : > { %v362_v8 = vsel %vm361_vm0, %v360_v4, %v2614_v51 }
 0x1af   : > { %v368_v10 = vperm.slane %v362_v8, %v2634_v58  ;;  %v398_v11 = vsel %vm361_vm0, %v397_v6, %v372_v7  ;;  %v399_v12 = vrot.slane %v372_v7, 4 }
 0x1b0   : > { %v404_v13 = vperm.slane %v398_v11, %v2645_v3 }
 0x1b1   : > { %v386_v14 = vsel %vm361_vm0, %v385_v9, %v368_v10  ;;  %v387_v15 = vrot.slane %v368_v10, 4  ;;  %v400_v16 = vsel %vm361_vm0, %v384_v63, %v399_v12 }
 0x1b2   : > { %v392_v17 = vperm.slane %v386_v14, %v2645_v3  ;;  %v408_v18 = vperm.slane %v400_v16, %v2645_v3  ;;  %v413_v20 = vrot.slane %v404_v13, 4 }
 0x1b3   : > { %v388_v19 = vsel %vm361_vm0, %v380_v1, %v387_v15  ;;  %v472_v1 = vpop.permute.xlu1 %471 }
 0x1b4   : > { %v415_v21 = vrot.slane %v408_v18, 4  ;;  %v396_v22 = vperm.slane %v388_v19, %v2645_v3  ;;  %v409_v23 = vrot.slane %v392_v17, 4  ;;  %v414_v29 = vsel %vm361_vm0, 0.0, %v413_v20 }
 0x1b5   : > { %v485_v5 = vrot.slane %v472_v1, 4 }
 0x1b6   : > { %v416_v24 = vsel %vm361_vm0, 0.0, %v415_v21  ;;  %v411_v25 = vrot.slane %v396_v22, 4  ;;  %v428_v26 = vsel %vm361_vm0, %v415_v21, %v404_v13  ;;  %v410_v36 = vsel %vm361_vm0, 0.0, %v409_v23 }
 0x1b7   : > { %v433_v27 = vrot.slane %v416_v24, 4  ;;  %v432_v28 = vperm.slane %v428_v26, %v2634_v58 }
 0x1b8   : > { %v412_v30 = vsel %vm361_vm0, 0.0, %v411_v25  ;;  %v417_v31 = vsel %vm361_vm0, %v411_v25, %v392_v17 }
 0x1b9   : > { %v421_v32 = vperm.slane %v417_v31, %v2634_v58  ;;  %v422_v33 = vrot.slane %v412_v30, 4  ;;  %v434_v34 = vsel %vm361_vm0, %v433_v27, %v414_v29  ;;  %v453_v35 = vrot.slane %v432_v28, 4 }
 0x1ba   : > { %v438_v37 = vperm.slane %v434_v34, %v2634_v58 }
 0x1bb   : > { %v423_v38 = vsel %vm361_vm0, %v422_v33, %v410_v36  ;;  %v441_v39 = vrot.slane %v421_v32, 4 }
 0x1bc   : > { %v427_v40 = vperm.slane %v423_v38, %v2634_v58  ;;  %v451_v41 = vrot.slane %v438_v37, 4  ;;  %v454_v42 = vsel %vm361_vm0, %v438_v37, %v453_v35 }
 0x1bd   : > { %v462_v43 = vperm.slane %v454_v42, %v2645_v3 }
 0x1be   : > { %v439_v44 = vrot.slane %v427_v40, 4  ;;  %v452_v45 = vsel %vm361_vm0, %v451_v41, %v432_v28  ;;  %v442_v46 = vsel %vm361_vm0, %v427_v40, %v441_v39 }
 0x1bf   : > { %v458_v47 = vperm.slane %v452_v45, %v2645_v3  ;;  %v450_v49 = vperm.slane %v442_v46, %v2645_v3  ;;  %v467_v50 = vrot.slane %v462_v43, 4 }
 0x1c0   : > { %v440_v52 = vsel %vm361_vm0, %v439_v44, %v421_v32 }
 0x1c1   : > { %v446_v53 = vperm.slane %v440_v52, %v2645_v3  ;;  %v463_v56 = vrot.slane %v458_v47, 4  ;;  %v469_v57 = vrot.slane %v450_v49, 4  ;;  %v2685_v59 = vsel %vm361_vm0, %v467_v50, %v450_v49 }
 0x1c3   : > { %v2688_v60 = vsel %vm361_vm0, %v463_v56, %v446_v53  ;;  %v2691_v61 = vsel %vm361_vm0, %v462_v43, %v469_v57  ;;  %v465_v62 = vrot.slane %v446_v53, 4 }
 0x1c5   : > { %v2694_v63 = vsel %vm361_vm0, %v458_v47, %v465_v62 }
 0x1fe   : > { %v474_v0 = vpop.permute.xlu2 %473 }
 0x1ff   : > { %v497_v10 = vrot.slane %v474_v0, 4 }
 0x206   : > { %v476_v4 = vpop.permute.xlu2 %475 }
 0x207   : > { %v483_v6 = vrot.slane %v476_v4, 4  ;;  %v486_v7 = vsel %vm361_vm0, %v476_v4, %v485_v5 }
 0x208   : > { %v494_v9 = vperm.slane %v486_v7, %v2634_v58 }
 0x209   : > { %v484_v8 = vsel %vm361_vm0, %v483_v6, %v472_v1 }
 0x20a   : > { %v490_v11 = vperm.slane %v484_v8, %v2634_v58  ;;  %v521_v15 = vrot.slane %v494_v9, 4 }
 0x20c   : > { %v509_v18 = vrot.slane %v490_v11, 4 }
 0x216   : > { %v478_v12 = vpop.permute.xlu0 %477 }
 0x217   : > { %v495_v13 = vrot.slane %v478_v12, 4  ;;  %v498_v14 = vsel %vm361_vm0, %v478_v12, %v497_v10 }
 0x218   : > { %v506_v16 = vperm.slane %v498_v14, %v2634_v58 }
 0x219   : > { %v496_v17 = vsel %vm361_vm0, %v495_v13, %v474_v0 }
 0x21a   : > { %v502_v19 = vperm.slane %v496_v17, %v2634_v58  ;;  %v519_v20 = vrot.slane %v506_v16, 4  ;;  %v522_v21 = vsel %vm361_vm0, %v506_v16, %v521_v15 }
 0x21b   : > { %v530_v22 = vperm.slane %v522_v21, %v2645_v3 }
 0x21c   : > { %v507_v23 = vrot.slane %v502_v19, 4  ;;  %v510_v24 = vsel %vm361_vm0, %v502_v19, %v509_v18  ;;  %v520_v25 = vsel %vm361_vm0, %v519_v20, %v494_v9 }
 0x21d   : > { %v518_v26 = vperm.slane %v510_v24, %v2645_v3  ;;  %v526_v27 = vperm.slane %v520_v25, %v2645_v3  ;;  %v537_v28 = vrot.slane %v530_v22, 4 }
 0x21e   : > { %v508_v29 = vsel %vm361_vm0, %v507_v23, %v490_v11 }
 0x21f   : > { %v514_v30 = vperm.slane %v508_v29, %v2645_v3  ;;  %v533_v31 = vrot.slane %v518_v26, 4  ;;  %v535_v32 = vrot.slane %v526_v27, 4  ;;  %v538_v33 = vsel %vm361_vm0, 0.0, %v537_v28 }
 0x220   : > { %v550_v34 = vsel %vm361_vm0, %v537_v28, %v526_v27  ;;  %v555_v35 = vrot.slane %v538_v33, 4 }
 0x221   : > { %v531_v36 = vrot.slane %v514_v30, 4  ;;  %v534_v37 = vsel %vm361_vm0, 0.0, %v533_v31  ;;  %v536_v38 = vsel %vm361_vm0, 0.0, %v535_v32  ;;  %v539_v39 = vsel %vm361_vm0, %v533_v31, %v514_v30 }
 0x222   : > { %v544_v40 = vrot.slane %v534_v37, 4  ;;  %v543_v41 = vperm.slane %v539_v39, %v2634_v58  ;;  %v554_v42 = vperm.slane %v550_v34, %v2634_v58  ;;  %v556_v43 = vsel %vm361_vm0, %v555_v35, %v536_v38 }
 0x223   : > { %v532_v44 = vsel %vm361_vm0, 0.0, %v531_v36  ;;  %v560_v45 = vperm.slane %v556_v43, %v2634_v58 }
 0x224   : > { %v545_v46 = vsel %vm361_vm0, %v544_v40, %v532_v44  ;;  %v563_v47 = vrot.slane %v543_v41, 4  ;;  %v575_v49 = vrot.slane %v554_v42, 4 }
 0x225   : > { %v549_v50 = vperm.slane %v545_v46, %v2634_v58  ;;  %v573_v52 = vrot.slane %v560_v45, 4 }
 0x226   : > { %v576_v53 = vsel %vm361_vm0, %v560_v45, %v575_v49 }
 0x227   : > { %v561_v56 = vrot.slane %v549_v50, 4  ;;  %v574_v57 = vsel %vm361_vm0, %v573_v52, %v554_v42  ;;  %v564_v62 = vsel %vm361_vm0, %v549_v50, %v563_v47  ;;  %v584_v0 = vperm.slane %v576_v53, %v2645_v3 }
 0x228   : > { %v580_v1 = vperm.slane %v574_v57, %v2645_v3  ;;  %v572_v4 = vperm.slane %v564_v62, %v2645_v3 }
 0x229   : > { %v562_v5 = vsel %vm361_vm0, %v561_v56, %v543_v41  ;;  %v589_v6 = vrot.slane %v584_v0, 4 }
 0x22a   : > { %v568_v7 = vperm.slane %v562_v5, %v2645_v3  ;;  %v585_v8 = vrot.slane %v580_v1, 4  ;;  %v591_v9 = vrot.slane %v572_v4, 4 }
 0x22b   : > { %v590_v13 = vsel %vm361_vm0, %v589_v6, %v572_v4 }
 0x22c   : > { %v586_v10 = vsel %vm361_vm0, %v585_v8, %v568_v7  ;;  %v592_v11 = vsel %vm361_vm0, %v584_v0, %v591_v9  ;;  %v587_v12 = vrot.slane %v568_v7, 4 }
 0x22d   : > { %2258 = vmatpush.xpose.msk.msra.mxu2 %vm715_vm1, %v586_v10  ;;  %2264 = vmatpush.xpose.msk.msra.mxu3 %vm715_vm1, %v592_v11 }
 0x22e   : > { %v588_v14 = vsel %vm361_vm0, %v580_v1, %v587_v12 }
 0x22f   : > { %2260 = vmatpush.xpose.msk.msrb.mxu1 %vm715_vm1, %v588_v14 }
 0x230   : > { %2259 = vmatmul.msk.f32.vlgmr.msra.gmra.mxu2 %vm715_vm1, %v2688_v60  ;;  %2265 = vmatmul.msk.f32.vlgmr.msra.gmra.mxu3 %vm715_vm1, %v2691_v61 }
 0x231   : > { %2262 = vmatpush.xpose.msk.msrb.mxu2 %vm715_vm1, %v590_v13 }
 0x232   : > { %2261 = vmatmul.msk.f32.vlgmr.msrb.gmra.mxu1 %vm715_vm1, %v2694_v63  ;;  %v2344_v63 = vpack.i.bf16 %v2626_v55, %v2614_v51 }
 0x238   : > { %2263 = vmatmul.msk.f32.vlgmr.msrb.gmra.mxu2 %vm715_vm1, %v2685_v59  ;;  %v2349_v59 = vpack.i.bf16 %v2624_v54, %v2643_v2 }
 0x2af   : > { %v765_v15 = vpop.f32.mrf.mxu1 }
 0x2b0   : > { %v823_v16 = vsel %vm715_vm1, %v765_v15, -inf }
 0x2b1   : > { %824 = vmax.xlane.f32.xlu0 %v823_v16 }
 0x2b3   : > { %v739_v17 = vpop.f32.mrf.mxu2  ;;  %v817_v18 = vpop.f32.mrf.mxu3 }
 0x2b4   : > { %v829_v19 = vsel %vm715_vm1, %v817_v18, -inf  ;;  %v820_v20 = vsel %vm715_vm1, %v739_v17, -inf }
 0x2b5   : > { %830 = vmax.xlane.f32.xlu2 %v829_v19  ;;  %821 = vmax.xlane.f32.xlu1 %v820_v20 }
 0x2bb   : > { %v791_v60 = vpop.f32.mrf.mxu2 }
 0x2bc   : > { %v826_v61 = vsel %vm715_vm1, %v791_v60, -inf }
 0x2bd   : > { %827 = vmax.xlane.f32.xlu2 %v826_v61 }
 0x2ce   : > { %2345 = vrot.lane.b32.xlu1 %v2344_v63, %s2453_s20 }
 0x2d5   : > { %2350 = vrot.lane.b32.xlu2 %v2349_v59, %s2453_s20 }
 0x324   : > { %v825_v28 = vpop.xlane.xlu0 %824 }
 0x325   : > { %v833_v31 = vsub.f32 %v765_v15, %v825_v28 }
 0x327   : > { %v838_v32 = vmul.f32 1.442695, %v833_v31 }
 0x328   : > { %v831_v21 = vpop.xlane.xlu2 %830  ;;  %v822_v22 = vpop.xlane.xlu1 %821 }
 0x329   : > { %v835_v23 = vsub.f32 %v817_v18, %v831_v21  ;;  %v832_v24 = vsub.f32 %v739_v17, %v822_v22 }
 0x32b   : > { %v842_v25 = vmul.f32 1.442695, %v835_v23  ;;  %v836_v26 = vmul.f32 1.442695, %v832_v24 }
 0x32d   : > { %2381 = vpow2.f32 %v842_v25 }
 0x32e   : > { %2383 = vpow2.f32 %v836_v26 }
 0x330   : > { %v828_v27 = vpop.xlane.xlu2 %827 }
 0x331   : > { %v834_v29 = vsub.f32 %v791_v60, %v828_v27 }
 0x333   : > { %v2758_v51 = vpop.eup %2381  ;;  %v840_v55 = vmul.f32 1.442695, %v834_v29 }
 0x334   : > { %v2760_v30 = vpop.eup %2383  ;;  %v853_v54 = vsel %vm715_vm1, %v2758_v51, 0.0 }
 0x335   : > { %2385 = vpow2.f32 %v840_v55  ;;  %854 = vadd.xlane.f32.xlu1 %v853_v54  ;;  %v844_v2 = vsel %vm715_vm1, %v2760_v30, 0.0 }
 0x336   : > { %845 = vadd.xlane.f32.xlu0 %v844_v2  ;;  %2387 = vpow2.f32 %v838_v32 }
 0x338   : > { %v2351_v33 = vpop.permute.xlu2 %2350 }
 0x339   : > { %v2353_v36 = vunpack.i.h.bf16 %v2351_v33  ;;  %v2352_v37 = vunpack.i.l.bf16 %v2351_v33 }
 0x33b   : > { %v2766_v34 = vpop.eup %2385  ;;  %v617_v39 = vrot.slane %v2353_v36, 4  ;;  %v605_v40 = vrot.slane %v2352_v37, 4 }
 0x33c   : > { %v850_v35 = vsel %vm715_vm1, %v2766_v34, 0.0  ;;  %v2770_v43 = vpop.eup %2387 }
 0x33d   : > { %v847_v56 = vsel %vm715_vm1, %v2770_v43, 0.0 }
 0x33e   : > { %851 = vadd.xlane.f32.xlu0 %v850_v35 }
 0x340   : > { %v2346_v38 = vpop.permute.xlu1 %2345 }
 0x341   : > { %v2348_v41 = vunpack.i.h.bf16 %v2346_v38  ;;  %v2347_v42 = vunpack.i.l.bf16 %v2346_v38 }
 0x343   : > { %v619_v44 = vrot.slane %v2348_v41, 4  ;;  %v606_v45 = vsel %vm361_vm0, %v605_v40, %v2347_v42  ;;  %v607_v46 = vrot.slane %v2347_v42, 4  ;;  %v618_v47 = vsel %vm361_vm0, %v617_v39, %v2348_v41 }
 0x344   : > { %v612_v49 = vperm.slane %v606_v45, %v2634_v58  ;;  %v624_v50 = vperm.slane %v618_v47, %v2634_v58 }
 0x345   : > { %v608_v52 = vsel %vm361_vm0, %v2352_v37, %v607_v46  ;;  %v620_v53 = vsel %vm361_vm0, %v2353_v36, %v619_v44 }
 0x346   : > { %v616_v57 = vperm.slane %v608_v52, %v2634_v58  ;;  %v628_v62 = vperm.slane %v620_v53, %v2634_v58  ;;  %v629_v0 = vrot.slane %v624_v50, 4  ;;  %v631_v1 = vrot.slane %v612_v49, 4  ;;  %848 = vadd.xlane.f32.xlu0 %v847_v56 }
 0x348   : > { %v630_v4 = vsel %vm361_vm0, %v629_v0, %v612_v49  ;;  %v632_v5 = vsel %vm361_vm0, %v624_v50, %v631_v1  ;;  %v641_v6 = vrot.slane %v628_v62, 4  ;;  %v643_v7 = vrot.slane %v616_v57, 4 }
 0x349   : > { %v636_v8 = vperm.slane %v630_v4, %v2645_v3  ;;  %v640_v9 = vperm.slane %v632_v5, %v2645_v3 }
 0x34a   : > { %v642_v10 = vsel %vm361_vm0, %v641_v6, %v616_v57  ;;  %v644_v11 = vsel %vm361_vm0, %v628_v62, %v643_v7 }
 0x34b   : > { %v648_v12 = vperm.slane %v642_v10, %v2645_v3  ;;  %v652_v13 = vperm.slane %v644_v11, %v2645_v3  ;;  %v653_v14 = vrot.slane %v636_v8, 4  ;;  %v655_v15 = vrot.slane %v640_v9, 4 }
 0x34d   : > { %v656_v16 = vsel %vm361_vm0, 0.0, %v655_v15  ;;  %v657_v17 = vrot.slane %v648_v12, 4  ;;  %v659_v18 = vrot.slane %v652_v13, 4  ;;  %v661_v20 = vsel %vm361_vm0, %v655_v15, %v636_v8 }
 0x34e   : > { %v666_v19 = vrot.slane %v656_v16, 4  ;;  %v654_v60 = vsel %vm361_vm0, 0.0, %v653_v14  ;;  %v665_v63 = vperm.slane %v661_v20, %v2634_v58 }
 0x34f   : > { %v660_v61 = vsel %vm361_vm0, 0.0, %v659_v18  ;;  %v672_v59 = vsel %vm361_vm0, %v659_v18, %v648_v12  ;;  %v658_v24 = vsel %vm361_vm0, 0.0, %v657_v17 }
 0x350   : > { %v677_v21 = vrot.slane %v660_v61, 4  ;;  %v667_v22 = vsel %vm361_vm0, %v666_v19, %v654_v60  ;;  %v676_v23 = vperm.slane %v672_v59, %v2634_v58  ;;  %v685_v26 = vrot.slane %v665_v63, 4 }
 0x351   : > { %v671_v25 = vperm.slane %v667_v22, %v2634_v58 }
 0x352   : > { %v678_v27 = vsel %vm361_vm0, %v677_v21, %v658_v24  ;;  %v697_v28 = vrot.slane %v676_v23, 4 }
 0x353   : > { %v682_v29 = vperm.slane %v678_v27, %v2634_v58  ;;  %v683_v55 = vrot.slane %v671_v25, 4  ;;  %v686_v31 = vsel %vm361_vm0, %v671_v25, %v685_v26 }
 0x354   : > { %v694_v32 = vperm.slane %v686_v31, %v2645_v3 }
 0x355   : > { %v684_v54 = vsel %vm361_vm0, %v683_v55, %v665_v63  ;;  %v695_v2 = vrot.slane %v682_v29, 4  ;;  %v698_v33 = vsel %vm361_vm0, %v682_v29, %v697_v28 }
 0x356   : > { %v690_v35 = vperm.slane %v684_v54, %v2645_v3  ;;  %v706_v36 = vperm.slane %v698_v33, %v2645_v3  ;;  %v713_v41 = vrot.slane %v694_v32, 4 }
 0x357   : > { %v696_v37 = vsel %vm361_vm0, %v695_v2, %v676_v23 }
 0x358   : > { %v702_v38 = vperm.slane %v696_v37, %v2645_v3  ;;  %v709_v39 = vrot.slane %v690_v35, 4  ;;  %v711_v40 = vrot.slane %v706_v36, 4  ;;  %v714_v47 = vsel %vm361_vm0, %v706_v36, %v713_v41 }
 0x35a   : > { %v710_v42 = vsel %vm361_vm0, %v702_v38, %v709_v39  ;;  %v712_v44 = vsel %vm361_vm0, %v711_v40, %v694_v32  ;;  %v707_v45 = vrot.slane %v702_v38, 4 }
 0x35b   : > { %905 = vmatpush.msra.mxu2 %v710_v42  ;;  %928 = vmatpush.msrb.mxu3 %v712_v44 }
 0x35c   : > { %v708_v46 = vsel %vm361_vm0, %v707_v45, %v690_v35 }
 0x35d   : > { %882 = vmatpush.msra.mxu1 %v708_v46 }
 0x35f   : > { %951 = vmatpush.msrb.mxu1 %v714_v47 }
 0x3a8   : > { %v855_v50 = vpop.xlane.xlu1 %854 }
 0x3a9   : > { %v846_v49 = vpop.xlane.xlu0 %845 }
 0x3aa   : > { %2389 = vrcp.f32 %v846_v49 }
 0x3ab   : > { %2391 = vrcp.f32 %v855_v50 }
 0x3b0   : > { %v2390_v52 = vpop.eup %2389 }
 0x3b1   : > { %v860_v53 = vmul.f32 %v2390_v52, %v2760_v30  ;;  %v852_v56 = vpop.xlane.xlu0 %851  ;;  %v2392_v57 = vpop.eup %2391 }
 0x3b2   : > { %2393 = vrcp.f32 %v852_v56  ;;  %v863_v0 = vmul.f32 %v2392_v57, %v2758_v51 }
 0x3b3   : > { %2266 = vmatmul.msk.f32.vlgmr.msra.gmra.mxu1 %vm715_vm1, %v860_v53 }
 0x3b8   : > { %v2394_v62 = vpop.eup %2393 }
 0x3b9   : > { %v849_v1 = vpop.xlane.xlu0 %848  ;;  %v862_v4 = vmul.f32 %v2394_v62, %v2766_v34 }
 0x3ba   : > { %2395 = vrcp.f32 %v849_v1 }
 0x3bb   : > { %2268 = vmatmul.msk.f32.vlgmr.msrb.gmra.mxu3 %vm715_vm1, %v862_v4  ;;  %2269 = vmatmul.msk.f32.vlgmr.msrb.gmra.mxu1 %vm715_vm1, %v863_v0 }
 0x3c0   : > { %v2396_v5 = vpop.eup %2395 }
 0x3c1   : > { %v861_v6 = vmul.f32 %v2396_v5, %v2770_v43 }
 0x3c3   : > { %2267 = vmatmul.msk.f32.vlgmr.msra.gmra.mxu2 %vm715_vm1, %v861_v6 }
 0x430   : > { %v884_v30 = vpop.f32.mrf.mxu1 }
 0x431   : > { %v958_v9 = vrot.slane %v884_v30, 4 }
 0x438   : > { %v953_v51 = vpop.f32.mrf.mxu1 }
 0x439   : > { %v968_v12 = vrot.slane %v953_v51, 4 }
 0x43e   : > { %v930_v7 = vpop.f32.mrf.mxu3 }
 0x43f   : > { %v956_v8 = vrot.slane %v930_v7, 4  ;;  %v959_v11 = vsel %vm361_vm0, %v930_v7, %v958_v9 }
 0x440   : > { %v967_v13 = vperm.slane %v959_v11, %v2634_v58  ;;  %v1085_v11 = vld [vmem:[%s3348_s3 + $0x10] sm:$0xff] }
 0x441   : > { %v957_v10 = vsel %vm361_vm0, %v956_v8, %v884_v30 }
 0x442   : > { %v963_v34 = vperm.slane %v957_v10, %v2634_v58  ;;  %v994_v19 = vrot.slane %v967_v13, 4 }
 0x444   : > { %v982_v16 = vrot.slane %v963_v34, 4 }
 0x446   : > { %v907_v14 = vpop.f32.mrf.mxu2 }
 0x447   : > { %v969_v15 = vsel %vm361_vm0, %v968_v12, %v907_v14  ;;  %v970_v43 = vrot.slane %v907_v14, 4  ;;  %v1083_v12 = vld [vmem:[%s3348_s3] sm:$0xff] }
 0x448   : > { %v975_v17 = vperm.slane %v969_v15, %v2634_v58 }
 0x449   : > { %v971_v18 = vsel %vm361_vm0, %v953_v51, %v970_v43  ;;  %v1086_v51 = vld [vmem:[%s3348_s3 + $0x18] sm:$0xff] }
 0x44a   : > { %v979_v20 = vperm.slane %v971_v18, %v2634_v58  ;;  %v980_v60 = vrot.slane %v975_v17, 4  ;;  %v983_v61 = vsel %vm361_vm0, %v975_v17, %v982_v16  ;;  %1104 = vmatpush.msrb.mxu2 %v1086_v51  ;;  %v2365_v18 = vld [vmem:[%s3349_s4 + $0x1] ss:$0 sm:$0xff]  ;;  %v2369_v51 = vld [vmem:[%s3349_s4 + $0x8] ss:$0 sm:$0xff] }
 0x44b   : > { %v991_v63 = vperm.slane %v983_v61, %v2645_v3  ;;  %v2457_v61 = vmov 32.0  }
 0x44c   : > { %v981_v59 = vsel %vm361_vm0, %v980_v60, %v963_v34  ;;  %v992_v21 = vrot.slane %v979_v20, 4  ;;  %v995_v22 = vsel %vm361_vm0, %v979_v20, %v994_v19  ;;  %v1084_v34 = vld [vmem:[%s3348_s3 + $0x8] sm:$0xff]  ;;  %1105 = vmatpush.msrb.mxu2 %v1085_v11  ;;  %2397 = vrcp.f32 %v2457_v61 }
 0x44d   : > { %v987_v23 = vperm.slane %v981_v59, %v2645_v3  ;;  %v1003_v24 = vperm.slane %v995_v22, %v2645_v3  ;;  %v1006_v25 = vrot.slane %v991_v63, 4 }
 0x44e   : > { %v993_v26 = vsel %vm361_vm0, %v992_v21, %v967_v13  ;;  %1106 = vmatpush.msrb.mxu2 %v1084_v34 }
 0x44f   : > { %v999_v27 = vperm.slane %v993_v26, %v2645_v3  ;;  %v1004_v28 = vrot.slane %v987_v23, 4  ;;  %v1007_v29 = vsel %vm361_vm0, 0.0, %v1006_v25  ;;  %v1010_v55 = vrot.slane %v1003_v24, 4 }
 0x450   : > { %v1012_v31 = vsel %vm361_vm0, %v1006_v25, %v987_v23  ;;  %v1017_v54 = vrot.slane %v1007_v29, 4  ;;  %1107 = vmatpush.msrb.mxu2 %v1083_v12 }
 0x451   : > { %v1005_v2 = vsel %vm361_vm0, 0.0, %v1004_v28  ;;  %v1008_v32 = vrot.slane %v999_v27, 4  ;;  %v1011_v33 = vsel %vm361_vm0, 0.0, %v1010_v55  ;;  %v1016_v35 = vperm.slane %v1012_v31, %v2634_v58  ;;  %v1150_v31 = vld [vmem:[%s3348_s3 + $0x30] sm:$0xff] }
 0x452   : > { %v1028_v36 = vrot.slane %v1011_v33, 4  ;;  %v1018_v37 = vsel %vm361_vm0, %v1017_v54, %v1005_v2  ;;  %v1023_v38 = vsel %vm361_vm0, %v1010_v55, %v999_v27  ;;  %v2398_v63 = vpop.eup %2397  ;;  %v1151_v55 = vld [vmem:[%s3348_s3 + $0x38] sm:$0xff]  ;;  %v1149_v54 = vld [vmem:[%s3348_s3 + $0x28] sm:$0xff]  ;;  %v1148_v2 = vld [vmem:[%s3348_s3 + $0x20] sm:$0xff] }
 0x453   : > { %v1009_v39 = vsel %vm361_vm0, 0.0, %v1008_v32  ;;  %v1022_v40 = vperm.slane %v1018_v37, %v2634_v58  ;;  %v1027_v41 = vperm.slane %v1023_v38, %v2634_v58  ;;  %v1036_v42 = vrot.slane %v1016_v35, 4  ;;  %1177 = vmatpush.msra.mxu3 %v1151_v55  ;;  %v2277_v32 = vld [vmem:[%s3347_s2 + $0x38] sm:$0xff]  ;;  %v2276_v33 = vld [vmem:[%s3347_s2 + $0x30] sm:$0xff]  ;;  %v2275_v37 = vld [vmem:[%s3347_s2 + $0x28] sm:$0xff] }
 0x454   : > { %v1029_v44 = vsel %vm361_vm0, %v1028_v36, %v1009_v39  ;;  %v1118_v59 = vmul.f32 32.0, %v2398_v63  ;;  %vm1122_vm4 = vweird.f32 %v2398_v63  ;;  %v2274_v39 = vld [vmem:[%s3347_s2 + $0x20] sm:$0xff] }
 0x455   : > { %v1033_v45 = vperm.slane %v1029_v44, %v2634_v58  ;;  %v1048_v46 = vrot.slane %v1027_v41, 4  ;;  %v1034_v47 = vrot.slane %v1022_v40, 4  ;;  %v1037_v49 = vsel %vm361_vm0, %v1022_v40, %v1036_v42  ;;  %1178 = vmatpush.msra.mxu3 %v1150_v31  ;;  %v1159_v40 = vld [vmem:[%s3348_s3 + $0x78] sm:$0xff]  ;;  %v1157_v42 = vld [vmem:[%s3348_s3 + $0x68] sm:$0xff] }
 0x456   : > { %v1045_v0 = vperm.slane %v1037_v49, %v2645_v3  ;;  %v1119_v21 = vsub.f32 1.0, %v1118_v59  ;;  %1200 = vmatpush.msra.mxu1 %v1159_v40  ;;  %v2999_v59 = vld [vmem:[%s3350_s5 + $0x10] sm:$0xff] }
 0x457   : > { %v1049_v50 = vsel %vm361_vm0, %v1033_v45, %v1048_v46  ;;  %v1035_v52 = vsel %vm361_vm0, %v1034_v47, %v1016_v35  ;;  %v1046_v53 = vrot.slane %v1033_v45, 4  ;;  %1179 = vmatpush.msra.mxu3 %v1149_v54  ;;  %v1156_v45 = vld [vmem:[%s3348_s3 + $0x60] sm:$0xff]  ;;  %v1155_v47 = vld [vmem:[%s3348_s3 + $0x58] sm:$0xff] }
 0x458   : > { %v1057_v56 = vperm.slane %v1049_v50, %v2645_v3  ;;  %v1041_v57 = vperm.slane %v1035_v52, %v2645_v3  ;;  %v1064_v9 = vrot.slane %v1045_v0, 4  ;;  %v1120_v22 = vmul.f32 %v2398_v63, %v1119_v21 }
 0x459   : > { %v1047_v62 = vsel %vm361_vm0, %v1046_v53, %v1027_v41  ;;  %1180 = vmatpush.msra.mxu3 %v1148_v2  ;;  %v1158_v41 = vld [vmem:[%s3348_s3 + $0x70] sm:$0xff] }
 0x45a   : > { %v1062_v1 = vrot.slane %v1057_v56, 4  ;;  %v1053_v4 = vperm.slane %v1047_v62, %v2645_v3  ;;  %v1060_v5 = vrot.slane %v1041_v57, 4  ;;  %v1065_v10 = vsel %vm361_vm0, %v1057_v56, %v1064_v9  ;;  %1201 = vmatpush.msra.mxu1 %v1158_v41  ;;  %v2366_v56 = vld [vmem:[%s3349_s4 + $0x2] ss:$0 sm:$0xff]  ;;  %v2367_v62 = vld [vmem:[%s3349_s4 + $0x3] ss:$0 sm:$0xff] }
 0x45b   : > { %v1121_v23 = vadd.f32 %v2398_v63, %v1120_v22  ;;  %1286 = vmatpush.msrb.mxu3 %v2277_v32 }
 0x45c   : > { %v1063_v6 = vsel %vm361_vm0, %v1062_v1, %v1045_v0  ;;  %v1058_v30 = vrot.slane %v1053_v4, 4  ;;  %v1061_v7 = vsel %vm361_vm0, %v1053_v4, %v1060_v5  ;;  %1202 = vmatpush.msra.mxu1 %v1157_v42 }
 0x45d   : > { %1071 = vrot.lane.b32.xlu0 %v1063_v6, %s2454_s21  ;;  %1067 = vrot.lane.b32.xlu2 %v1061_v7, %s2455_s22  ;;  %v2885_v24 = vsel %vm1122_vm4, %v2398_v63, %v1121_v23  ;;  %v1154_v6 = vld [vmem:[%s3348_s3 + $0x50] sm:$0xff]  ;;  %v2368_v7 = vld [vmem:[%s3349_s4 + $0x4] ss:$0 sm:$0xff] }
 0x45e   : > { %v1059_v8 = vsel %vm361_vm0, %v1058_v30, %v1041_v57  ;;  %1287 = vmatpush.msrb.mxu3 %v2276_v33  ;;  %1203 = vmatpush.msra.mxu1 %v1156_v45  ;;  %v1153_v30 = vld [vmem:[%s3348_s3 + $0x48] sm:$0xff]  ;;  %v2993_v63 = vld [vmem:[%s3350_s5 + $0x18] sm:$0xff] }
 0x45f   : > { %1257 = vmatpush.msra.mxu2 %v2993_v63 }
 0x460   : > { %1288 = vmatpush.msrb.mxu3 %v2275_v37  ;;  %1204 = vmatpush.msra.mxu1 %v1155_v47 }
 0x461   : > { %1258 = vmatpush.msra.mxu2 %v2999_v59 }
 0x462   : > { %1289 = vmatpush.msrb.mxu3 %v2274_v39  ;;  %1205 = vmatpush.msra.mxu1 %v1154_v6 }
 0x464   : > { %1206 = vmatpush.msra.mxu1 %v1153_v30 }
 0x465   : > { %1075 = vrot.lane.b32.xlu2 %v1065_v10, %s2456_s23 }
 0x4b7   : > { %v1068_v13 = vpop.permute.xlu2 %1067 }
 0x4b8   : > { %v1078_v14 = vsel %vm715_vm1, %v1059_v8, %v1068_v13  ;;  %v2370_v13 = vld [vmem:[%s3349_s4 + $0x5] ss:$0 sm:$0xff] }
 0x4bf   : > { %v1076_v43 = vpop.permute.xlu2 %1075 }
 0x4cf   : > { %v1072_v15 = vpop.permute.xlu0 %1071 }
 0x4d0   : > { %v1080_v16 = vsel %vm1079_vm2, %v1078_v14, %v1072_v15 }
 0x4d1   : > { %v1082_v17 = vsel %vm1081_vm3, %v1080_v16, %v1076_v43 }
 0x4d2   : > { %2270 = vmatmul.msk.f32.vlgmr.msrb.gmra.mxu2 %vm326_vm15, %v1082_v17 }
 0x555   : > { %v1109_v19 = vpop.f32.mrf.mxu2 }
 0x556   : > { %v1110_v20 = vadd.f32 %v2365_v18, %v1109_v19 }
 0x558   : > { %v1114_v60 = vsel %vm326_vm15, %v1110_v20, 0.0 }
 0x559   : > { %1115 = vadd.xlane.f32.xlu2 %v1114_v60 }
 0x5cc   : > { %v1116_v25 = vpop.xlane.xlu2 %1115 }
 0x5cd   : > { %v1124_v26 = vmul.f32 %v2885_v24, %v1116_v25  ;;  %v3008_v25 = vld [vmem:[%s3350_s5 + $0x8] sm:$0xff] }
 0x5ce   : > { %1259 = vmatpush.msra.mxu2 %v3008_v25 }
 0x5cf   : > { %v1125_v27 = vsub.f32 %v1110_v20, %v1124_v26 }
 0x5d1   : > { %v1126_v28 = vmul.f32 %v1125_v27, %v1125_v27 }
 0x5d3   : > { %v1127_v29 = vsel %vm326_vm15, %v1126_v28, 0.0 }
 0x5d4   : > { %1128 = vadd.xlane.f32.xlu0 %v1127_v29 }
 0x647   : > { %v1129_v35 = vpop.xlane.xlu0 %1128 }
 0x648   : > { %v1130_v36 = vmul.f32 %v1129_v35, %v2885_v24 }
 0x64a   : > { %v1131_v38 = vadd.f32 1e-05, %v1130_v36 }
 0x64c   : > { %2399 = vrsqrt.f32 %v1131_v38  ;;  %vm1138_vm6 = vweird.f32 %v1131_v38 }
 0x652   : > { %v2400_v44 = vpop.eup %2399 }
 0x653   : > { %v1133_v46 = vmul.f32 %v2400_v44, %v1131_v38  ;;  %vm1139_vm5 = vweird.f32 %v2400_v44 }
 0x654   : > { %vm1140_vm7 = vmor %vm1138_vm6, %vm1139_vm5 }
 0x655   : > { %v1134_v49 = vmul.f32 %v2400_v44, %v1133_v46 }
 0x657   : > { %v1135_v50 = vmul.f32 0.5, %v1134_v49 }
 0x659   : > { %v1136_v52 = vsub.f32 1.5, %v1135_v50 }
 0x65b   : > { %v1137_v53 = vmul.f32 %v2400_v44, %v1136_v52 }
 0x65d   : > { %v1141_v57 = vsel %vm1140_vm7, %v2400_v44, %v1137_v53 }
 0x65e   : > { %v1142_v0 = vmul.f32 %v1141_v57, %v1125_v27  ;;  %v3016_v27 = vld [vmem:[%s3350_s5] sm:$0xff] }
 0x65f   : > { %1260 = vmatpush.msra.mxu2 %v3016_v27 }
 0x660   : > { %v1144_v1 = vmul.f32 %v2366_v56, %v1142_v0 }
 0x662   : > { %v1146_v4 = vadd.f32 %v2367_v62, %v1144_v1 }
 0x664   : > { %v2936_v5 = vadd.f32 %v1146_v4, %v2607_v48  ;;  %v1152_v48 = vld [vmem:[%s3348_s3 + $0x40] sm:$0xff] }
 0x665   : > { %1207 = vmatpush.msra.mxu1 %v1152_v48 }
 0x666   : > { %2271 = vmatmul.msk.f32.vlgmr.msra.gmra.mxu3 %vm326_vm15, %v2936_v5 }
 0x66e   : > { %2279 = vmatmul.msk.f32.vlgmr.msrb.gmra.mxu3 %vm326_vm15, %v2936_v5 }
 0x6e9   : > { %v1182_v8 = vpop.f32.mrf.mxu3 }
 0x6ea   : > { %v1183_v9 = vadd.f32 %v2368_v7, %v1182_v8 }
 0x6ec   : > { %v1185_v10 = vmax.f32 %v1183_v9, 0.0 }
 0x6ee   : > { %2272 = vmatmul.msk.f32.vlgmr.msra.gmra.mxu1 %vm1188_vm8, %v1185_v10 }
 0x6f1   : > { %v1291_v11 = vpop.f32.mrf.mxu3 }
 0x6f2   : > { %v2958_v34 = vadd.f32 %v2369_v51, %v1291_v11 }
 0x6f4   : > { %1301 = vrot.lane.b32.xlu0 %v2958_v34, %s2447_s16  ;;  %1298 = vrot.lane.b32.xlu2 %v2958_v34, %s2450_s19  ;;  %v1306_v22 = vrot.slane %v2958_v34, 4 }
 0x6fc   : > { %1414 = vrot.lane.b32.xlu2 %v2958_v34, %s2449_s18 }
 0x74e   : > { %v2966_v12 = vpop.permute.xlu2 %1298 }
 0x74f   : > { %1418 = vrot.lane.b32.xlu2 %v2966_v12, %s2449_s18  ;;  %v1304_v21 = vrot.slane %v2966_v12, 4  ;;  %v1307_v26 = vsel %vm361_vm0, %v2966_v12, %v1306_v22 }
 0x750   : > { %v1315_v54 = vperm.slane %v1307_v26, %v2634_v58 }
 0x751   : > { %v1305_v28 = vsel %vm361_vm0, %v1304_v21, %v2958_v34 }
 0x752   : > { %v1311_v33 = vperm.slane %v1305_v28, %v2634_v58  ;;  %v1342_v38 = vrot.slane %v1315_v54, 4 }
 0x754   : > { %v1330_v40 = vrot.slane %v1311_v33, 4 }
 0x756   : > { %v1415_v37 = vpop.permute.xlu2 %1414 }
 0x757   : > { %v1428_v7 = vrot.slane %v1415_v37, 4 }
 0x766   : > { %v2986_v61 = vpop.permute.xlu0 %1301 }
 0x767   : > { %v1316_v29 = vrot.slane %v2986_v61, 4 }
 0x76b   : > { %v1209_v14 = vpop.f32.mrf.mxu1 }
 0x76c   : > { %v1210_v15 = vadd.f32 %v2370_v13, %v1209_v14 }
 0x76e   : > { %v1214_v43 = vsel %vm326_vm15, %v1210_v15, 0.0 }
 0x76f   : > { %1215 = vadd.xlane.f32.xlu1 %v1214_v43 }
 0x788   : > { %1295 = vrot.lane.b32.xlu1 %v2958_v34, %s2448_s17 }
 0x7a9   : > { %v1419_v50 = vpop.permute.xlu2 %1418 }
 0x7aa   : > { %v1426_v1 = vrot.slane %v1419_v50, 4  ;;  %v1429_v11 = vsel %vm361_vm0, %v1419_v50, %v1428_v7 }
 0x7ac   : > { %v1427_v51 = vsel %vm361_vm0, %v1426_v1, %v1415_v37 }
 0x7e2   : > { %v1216_v16 = vpop.xlane.xlu1 %1215 }
 0x7e3   : > { %v1217_v17 = vmul.f32 %v1216_v16, %v2885_v24  ;;  %v2371_v16 = vld [vmem:[%s3349_s4 + $0x6] ss:$0 sm:$0xff] }
 0x7e5   : > { %v2977_v18 = vsub.f32 %v1210_v15, %v1217_v17  ;;  %v1433_v17 = vperm.slane %v1427_v51, %v2634_v58 }
 0x7e7   : > { %v1219_v19 = vmul.f32 %v2977_v18, %v2977_v18 }
 0x7e9   : > { %v1220_v20 = vsel %vm326_vm15, %v1219_v19, 0.0  ;;  %v1437_v19 = vperm.slane %v1429_v11, %v2634_v58 }
 0x7ea   : > { %1221 = vadd.xlane.f32.xlu1 %v1220_v20 }
 0x7fa   : > { %v2982_v60 = vpop.permute.xlu1 %1295 }
 0x7fb   : > { %1416 = vrot.lane.b32.xlu0 %v2982_v60, %s2449_s18  ;;  %v1318_v23 = vrot.slane %v2982_v60, 4  ;;  %v1317_v32 = vsel %vm361_vm0, %v1316_v29, %v2982_v60 }
 0x7fc   : > { %v1323_v39 = vperm.slane %v1317_v32, %v2634_v58 }
 0x7fd   : > { %v1319_v55 = vsel %vm361_vm0, %v2986_v61, %v1318_v23  ;;  %v2372_v23 = vld [vmem:[%s3349_s4 + $0x7] ss:$0 sm:$0xff] }
 0x7fe   : > { %v1327_v35 = vperm.slane %v1319_v55, %v2634_v58  ;;  %v1328_v44 = vrot.slane %v1323_v39, 4  ;;  %v1331_v45 = vsel %vm361_vm0, %v1323_v39, %v1330_v40 }
 0x7ff   : > { %v1339_v52 = vperm.slane %v1331_v45, %v2645_v3 }
 0x800   : > { %v1340_v41 = vrot.slane %v1327_v35, 4  ;;  %v1343_v42 = vsel %vm361_vm0, %v1327_v35, %v1342_v38  ;;  %v1329_v56 = vsel %vm361_vm0, %v1328_v44, %v1311_v33  ;;  %v1452_v35 = vrot.slane %v1433_v17, 4 }
 0x801   : > { %v1351_v46 = vperm.slane %v1343_v42, %v2645_v3  ;;  %v1335_v4 = vperm.slane %v1329_v56, %v2645_v3  ;;  %v1354_v6 = vrot.slane %v1339_v52, 4 }
 0x802   : > { %v1341_v49 = vsel %vm361_vm0, %v1340_v41, %v1315_v54 }
 0x803   : > { %1420 = vrot.lane.b32.xlu0 %v2986_v61, %s2449_s18  ;;  %v1347_v57 = vperm.slane %v1341_v49, %v2645_v3  ;;  %v1358_v62 = vrot.slane %v1351_v46, 4  ;;  %v1352_v13 = vrot.slane %v1335_v4, 4  ;;  %v1355_v14 = vsel %vm361_vm0, 0.0, %v1354_v6 }
 0x804   : > { %v1365_v22 = vrot.slane %v1355_v14, 4  ;;  %v1360_v56 = vsel %vm361_vm0, %v1354_v6, %v1335_v4 }
 0x805   : > { %v1356_v8 = vrot.slane %v1347_v57, 4  ;;  %v1359_v9 = vsel %vm361_vm0, 0.0, %v1358_v62  ;;  %v1353_v29 = vsel %vm361_vm0, 0.0, %v1352_v13  ;;  %v1364_v6 = vperm.slane %v1360_v56, %v2634_v58 }
 0x806   : > { %v1376_v43 = vrot.slane %v1359_v9, 4 }
 0x807   : > { %v1357_v21 = vsel %vm361_vm0, 0.0, %v1356_v8 }
 0x808   : > { %v1377_v33 = vsel %vm361_vm0, %v1376_v43, %v1357_v21 }
 0x809   : > { %v1381_v45 = vperm.slane %v1377_v33, %v2634_v58 }
 0x85d   : > { %v1222_v31 = vpop.xlane.xlu1 %1221 }
 0x85e   : > { %v1223_v2 = vmul.f32 %v1222_v31, %v2885_v24  ;;  %v1371_v31 = vsel %vm361_vm0, %v1358_v62, %v1347_v57 }
 0x85f   : > { %v1375_v40 = vperm.slane %v1371_v31, %v2634_v58 }
 0x860   : > { %v1224_v36 = vadd.f32 1e-05, %v1223_v2 }
 0x862   : > { %2401 = vrsqrt.f32 %v1224_v36  ;;  %vm1231_vm10 = vweird.f32 %v1224_v36 }
 0x868   : > { %v2402_v47 = vpop.eup %2401 }
 0x869   : > { %v1226_v53 = vmul.f32 %v2402_v47, %v1224_v36  ;;  %vm1232_vm9 = vweird.f32 %v2402_v47  ;;  %v1464_v36 = vrot.slane %v1437_v19, 4 }
 0x86a   : > { %vm1233_vm11 = vmor %vm1231_vm10, %vm1232_vm9 }
 0x86b   : > { %v1227_v0 = vmul.f32 %v2402_v47, %v1226_v53 }
 0x86d   : > { %v1228_v30 = vmul.f32 0.5, %v1227_v0  ;;  %v1417_v48 = vpop.permute.xlu0 %1416 }
 0x86e   : > { %v1440_v28 = vrot.slane %v1417_v48, 4 }
 0x86f   : > { %v1229_v10 = vsub.f32 1.5, %v1228_v30  ;;  %v1396_v30 = vrot.slane %v1375_v40, 4 }
 0x871   : > { %v1230_v15 = vmul.f32 %v2402_v47, %v1229_v10 }
 0x873   : > { %v1234_v20 = vsel %vm1233_vm11, %v2402_v47, %v1230_v15 }
 0x874   : > { %v1235_v26 = vmul.f32 %v1234_v20, %v2977_v18  ;;  %v1366_v18 = vsel %vm361_vm0, %v1365_v22, %v1353_v29 }
 0x875   : > { %v1421_v55 = vpop.permute.xlu0 %1420  ;;  %v1370_v53 = vperm.slane %v1366_v18, %v2634_v58 }
 0x876   : > { %v1237_v54 = vmul.f32 %v2371_v16, %v1235_v26  ;;  %v1438_v2 = vrot.slane %v1421_v55, 4  ;;  %v1441_v32 = vsel %vm361_vm0, %v1421_v55, %v1440_v28 }
 0x877   : > { %v1449_v37 = vperm.slane %v1441_v32, %v2634_v58  ;;  %v1382_v11 = vrot.slane %v1370_v53, 4 }
 0x878   : > { %v1239_v38 = vadd.f32 %v2372_v23, %v1237_v54  ;;  %v1439_v39 = vsel %vm361_vm0, %v1438_v2, %v1417_v48  ;;  %v1394_v48 = vrot.slane %v1381_v45, 4  ;;  %v1397_v23 = vsel %vm361_vm0, %v1381_v45, %v1396_v30 }
 0x879   : > { %v1445_v41 = vperm.slane %v1439_v39, %v2634_v58  ;;  %v1462_v42 = vrot.slane %v1449_v37, 4  ;;  %v1465_v44 = vsel %vm361_vm0, %v1449_v37, %v1464_v36  ;;  %v1384_v2 = vrot.slane %v1364_v6, 4 }
 0x87a   : > { %v1473_v46 = vperm.slane %v1465_v44, %v2645_v3  ;;  %v1240_v47 = vadd.f32 %v1239_v38, %v2936_v5  ;;  %v1395_v26 = vsel %vm361_vm0, %v1394_v48, %v1375_v40  ;;  %v1405_v33 = vperm.slane %v1397_v23, %v2645_v3 }
 0x87b   : > { %v1450_v49 = vrot.slane %v1445_v41, 4  ;;  %v1453_v50 = vsel %vm361_vm0, %v1445_v41, %v1452_v35  ;;  %v1463_v52 = vsel %vm361_vm0, %v1462_v42, %v1437_v19  ;;  %v1383_v35 = vsel %vm361_vm0, %v1382_v11, %v1364_v6 }
 0x87c   : > { %v1461_v57 = vperm.slane %v1453_v50, %v2645_v3  ;;  %v1469_v62 = vperm.slane %v1463_v52, %v2645_v3  ;;  %v1480_v0 = vrot.slane %v1473_v46, 4  ;;  %2273 = vmatmul.msk.f32.vlgmr.msra.gmra.mxu2 %vm326_vm15, %v1240_v47  ;;  %v1401_v36 = vperm.slane %v1395_v26, %v2645_v3 }
 0x87d   : > { %v1451_v1 = vsel %vm361_vm0, %v1450_v49, %v1433_v17  ;;  %v1385_v45 = vsel %vm361_vm0, %v1370_v53, %v1384_v2  ;;  %v1389_v46 = vperm.slane %v1383_v35, %v2645_v3  ;;  %v1410_v50 = vrot.slane %v1405_v33, 4 }
 0x87e   : > { %v1457_v7 = vperm.slane %v1451_v1, %v2645_v3  ;;  %v1476_v8 = vrot.slane %v1461_v57, 4  ;;  %v1478_v9 = vrot.slane %v1469_v62, 4  ;;  %v1481_v10 = vsel %vm361_vm0, 0.0, %v1480_v0 }
 0x87f   : > { %v1493_v51 = vsel %vm361_vm0, %v1480_v0, %v1469_v62  ;;  %v1498_v4 = vrot.slane %v1481_v10, 4  ;;  %v1406_v57 = vrot.slane %v1401_v36, 4  ;;  %v1393_v1 = vperm.slane %v1385_v45, %v2645_v3 }
 0x880   : > { %v1474_v13 = vrot.slane %v1457_v7, 4  ;;  %v1477_v14 = vsel %vm361_vm0, 0.0, %v1476_v8  ;;  %v1479_v15 = vsel %vm361_vm0, 0.0, %v1478_v9  ;;  %v1482_v43 = vsel %vm361_vm0, %v1476_v8, %v1457_v7 }
 0x881   : > { %v1487_v16 = vrot.slane %v1477_v14, 4  ;;  %v1497_v17 = vperm.slane %v1493_v51, %v2634_v58  ;;  %v1499_v19 = vsel %vm361_vm0, %v1498_v4, %v1479_v15  ;;  %v1486_v20 = vperm.slane %v1482_v43, %v2634_v58  ;;  %v3125_v4 = vld [vmem:[%s3350_s5 + $0x20] ss:$0 sm:$0xff] }
 0x882   : > { %v1475_v21 = vsel %vm361_vm0, 0.0, %v1474_v13  ;;  %v1503_v22 = vperm.slane %v1499_v19, %v2634_v58  ;;  %v1408_v30 = vrot.slane %v1389_v46, 4  ;;  %v1411_v48 = vsel %vm361_vm0, %v1410_v50, %v1393_v1 }
 0x883   : > { %v1518_v28 = vrot.slane %v1497_v17, 4  ;;  %v1488_v29 = vsel %vm361_vm0, %v1487_v16, %v1475_v21  ;;  %v1506_v55 = vrot.slane %v1486_v20, 4  ;;  %v1407_v8 = vsel %vm361_vm0, %v1406_v57, %v1389_v46 }
 0x884   : > { %v1492_v31 = vperm.slane %v1488_v29, %v2634_v58  ;;  %v1516_v54 = vrot.slane %v1503_v22, 4  ;;  %v1409_v9 = vsel %vm361_vm0, %v1401_v36, %v1408_v30  ;;  %v1412_v10 = vrot.slane %v1393_v1, 4 }
 0x885   : > { %v1519_v32 = vsel %vm361_vm0, %v1503_v22, %v1518_v28  ;;  %v2359_v21 = vpack.i.bf16 %v2986_v61, %v2966_v12  ;;  %v2354_v22 = vpack.i.bf16 %v2982_v60, %v2958_v34 }
 0x886   : > { %v1507_v37 = vsel %vm361_vm0, %v1492_v31, %v1506_v55  ;;  %v1527_v38 = vperm.slane %v1519_v32, %v2645_v3  ;;  %v1504_v39 = vrot.slane %v1492_v31, 4  ;;  %v1517_v18 = vsel %vm361_vm0, %v1516_v54, %v1497_v17 }
 0x887   : > { %v1515_v40 = vperm.slane %v1507_v37, %v2645_v3  ;;  %v1523_v41 = vperm.slane %v1517_v18, %v2645_v3  ;;  %v1413_v51 = vsel %vm361_vm0, %v1405_v33, %v1412_v10 }
 0x888   : > { %v1532_v42 = vrot.slane %v1527_v38, 4  ;;  %v1505_v44 = vsel %vm361_vm0, %v1504_v39, %v1486_v20 }
 0x889   : > { %v1511_v47 = vperm.slane %v1505_v44, %v2645_v3  ;;  %v1528_v49 = vrot.slane %v1523_v41, 4  ;;  %v1534_v52 = vrot.slane %v1515_v40, 4 }
 0x88a   : > { %v1533_v56 = vsel %vm361_vm0, %v1532_v42, %v1515_v40 }
 0x88b   : > { %2284 = vmatpush.xpose.msk.msra.mxu3 %vm715_vm1, %v1533_v56  ;;  %v1529_v62 = vsel %vm361_vm0, %v1528_v49, %v1511_v47  ;;  %v1530_v0 = vrot.slane %v1511_v47, 4  ;;  %v1535_v53 = vsel %vm361_vm0, %v1527_v38, %v1534_v52 }
 0x88c   : > { %2280 = vmatpush.xpose.msk.msrb.mxu0 %vm715_vm1, %v1529_v62 }
 0x88d   : > { %v1531_v7 = vsel %vm361_vm0, %v1523_v41, %v1530_v0 }
 0x88e   : > { %2285 = vmatmul.msk.f32.vlgmr.msra.gmra.mxu3 %vm715_vm1, %v1411_v48  ;;  %2282 = vmatpush.xpose.msk.msrb.mxu2 %vm715_vm1, %v1531_v7 }
 0x88f   : > { %2281 = vmatmul.msk.f32.vlgmr.msrb.gmra.mxu0 %vm715_vm1, %v1407_v8 }
 0x890   : > { %2286 = vmatpush.xpose.msk.msra.mxu0 %vm715_vm1, %v1535_v53 }
 0x891   : > { %2283 = vmatmul.msk.f32.vlgmr.msrb.gmra.mxu2 %vm715_vm1, %v1409_v9 }
 0x897   : > { %2287 = vmatmul.msk.f32.vlgmr.msra.gmra.mxu0 %vm715_vm1, %v1413_v51 }
 0x8ff   : > { %v1262_v6 = vpop.f32.mrf.mxu2 }
 0x900   : > { %v1263_v11 = vadd.f32 %v3125_v4, %v1262_v6 }
 0x902   : > { %1265 = vst [vmem:[%s3130_s8] sm:$0xff] %v1263_v11 }
 0x90c   : > { %v1681_v13 = vpop.f32.mrf.mxu0 }
 0x90d   : > { %v1762_v14 = vsel %vm715_vm1, %v1681_v13, -inf }
 0x90e   : > { %1763 = vmax.xlane.f32.xlu1 %v1762_v14 }
 0x911   : > { %v1733_v15 = vpop.f32.mrf.mxu3 }
 0x912   : > { %v1768_v43 = vsel %vm715_vm1, %v1733_v15, -inf }
 0x913   : > { %1769 = vmax.xlane.f32.xlu2 %v1768_v43 }
 0x914   : > { %v1707_v16 = vpop.f32.mrf.mxu2  ;;  %v1759_v17 = vpop.f32.mrf.mxu0 }
 0x915   : > { %v1771_v19 = vsel %vm715_vm1, %v1759_v17, -inf  ;;  %v1765_v20 = vsel %vm715_vm1, %v1707_v16, -inf }
 0x916   : > { %1772 = vmax.xlane.f32.xlu1 %v1771_v19  ;;  %1766 = vmax.xlane.f32.xlu0 %v1765_v20 }
 0x92b   : > { %2360 = vrot.lane.b32.xlu2 %v2359_v21, %s2453_s20 }
 0x92f   : > { %2355 = vrot.lane.b32.xlu1 %v2354_v22, %s2453_s20 }
 0x981   : > { %v1764_v23 = vpop.xlane.xlu1 %1763 }
 0x982   : > { %v1774_v26 = vsub.f32 %v1681_v13, %v1764_v23 }
 0x984   : > { %v1778_v28 = vmul.f32 1.442695, %v1774_v26 }
 0x986   : > { %2403 = vpow2.f32 %v1778_v28  ;;  %v1770_v29 = vpop.xlane.xlu2 %1769 }
 0x987   : > { %v1776_v55 = vsub.f32 %v1733_v15, %v1770_v29 }
 0x989   : > { %v1782_v31 = vmul.f32 1.442695, %v1776_v55  ;;  %v1767_v54 = vpop.xlane.xlu0 %1766  ;;  %v1773_v33 = vpop.xlane.xlu1 %1772 }
 0x98a   : > { %v1775_v2 = vsub.f32 %v1707_v16, %v1767_v54  ;;  %v1777_v60 = vsub.f32 %v1759_v17, %v1773_v33 }
 0x98b   : > { %2405 = vpow2.f32 %v1782_v31 }
 0x98c   : > { %v3144_v32 = vpop.eup %2403  ;;  %v1780_v12 = vmul.f32 1.442695, %v1775_v2  ;;  %v1784_v36 = vmul.f32 1.442695, %v1777_v60 }
 0x98d   : > { %v1786_v61 = vsel %vm715_vm1, %v3144_v32, 0.0 }
 0x98e   : > { %1787 = vadd.xlane.f32.xlu1 %v1786_v61  ;;  %2407 = vpow2.f32 %v1780_v12  ;;  %v2361_v38 = vpop.permute.xlu2 %2360 }
 0x98f   : > { %2409 = vpow2.f32 %v1784_v36  ;;  %v2363_v18 = vunpack.i.h.bf16 %v2361_v38  ;;  %v2362_v40 = vunpack.i.l.bf16 %v2361_v38 }
 0x991   : > { %v3148_v34 = vpop.eup %2405  ;;  %v1560_v42 = vrot.slane %v2363_v18, 4  ;;  %v1548_v45 = vrot.slane %v2362_v40, 4 }
 0x992   : > { %v1792_v35 = vsel %vm715_vm1, %v3148_v34, 0.0 }
 0x993   : > { %1793 = vadd.xlane.f32.xlu0 %v1792_v35 }
 0x994   : > { %v3152_v37 = vpop.eup %2407 }
 0x995   : > { %v1789_v39 = vsel %vm715_vm1, %v3152_v37, 0.0  ;;  %v3156_v41 = vpop.eup %2409 }
 0x996   : > { %v1795_v49 = vsel %vm715_vm1, %v3156_v41, 0.0 }
 0x99b   : > { %1790 = vadd.xlane.f32.xlu0 %v1789_v39 }
 0x9a1   : > { %v2356_v44 = vpop.permute.xlu1 %2355 }
 0x9a2   : > { %v2358_v46 = vunpack.i.h.bf16 %v2356_v44  ;;  %v2357_v47 = vunpack.i.l.bf16 %v2356_v44 }
 0x9a3   : > { %1796 = vadd.xlane.f32.xlu0 %v1795_v49 }
 0x9a4   : > { %v1561_v50 = vsel %vm361_vm0, %v1560_v42, %v2358_v46  ;;  %v1562_v52 = vrot.slane %v2358_v46, 4  ;;  %v1549_v56 = vsel %vm361_vm0, %v1548_v45, %v2357_v47  ;;  %v1550_v57 = vrot.slane %v2357_v47, 4 }
 0x9a5   : > { %v1567_v62 = vperm.slane %v1561_v50, %v2634_v58  ;;  %v1555_v0 = vperm.slane %v1549_v56, %v2634_v58 }
 0x9a6   : > { %v1563_v1 = vsel %vm361_vm0, %v2363_v18, %v1562_v52  ;;  %v1551_v53 = vsel %vm361_vm0, %v2362_v40, %v1550_v57 }
 0x9a7   : > { %v1571_v30 = vperm.slane %v1563_v1, %v2634_v58  ;;  %v1572_v48 = vrot.slane %v1567_v62, 4  ;;  %v1559_v7 = vperm.slane %v1551_v53, %v2634_v58  ;;  %v1574_v8 = vrot.slane %v1555_v0, 4 }
 0x9a9   : > { %v1584_v9 = vrot.slane %v1571_v30, 4  ;;  %v1573_v10 = vsel %vm361_vm0, %v1572_v48, %v1555_v0  ;;  %v1575_v51 = vsel %vm361_vm0, %v1567_v62, %v1574_v8  ;;  %v1586_v6 = vrot.slane %v1559_v7, 4 }
 0x9aa   : > { %v1579_v11 = vperm.slane %v1573_v10, %v2645_v3  ;;  %v1583_v13 = vperm.slane %v1575_v51, %v2645_v3 }
 0x9ab   : > { %v1585_v14 = vsel %vm361_vm0, %v1584_v9, %v1559_v7  ;;  %v1587_v15 = vsel %vm361_vm0, %v1571_v30, %v1586_v6 }
 0x9ac   : > { %v1591_v43 = vperm.slane %v1585_v14, %v2645_v3  ;;  %v1595_v16 = vperm.slane %v1587_v15, %v2645_v3  ;;  %v1596_v17 = vrot.slane %v1579_v11, 4  ;;  %v1598_v19 = vrot.slane %v1583_v13, 4 }
 0x9ae   : > { %v1599_v20 = vsel %vm361_vm0, 0.0, %v1598_v19  ;;  %v1600_v21 = vrot.slane %v1591_v43, 4  ;;  %v1602_v22 = vrot.slane %v1595_v16, 4  ;;  %v1604_v23 = vsel %vm361_vm0, %v1598_v19, %v1579_v11 }
 0x9af   : > { %v1609_v26 = vrot.slane %v1599_v20, 4  ;;  %v1597_v28 = vsel %vm361_vm0, 0.0, %v1596_v17  ;;  %v1608_v55 = vperm.slane %v1604_v23, %v2634_v58 }
 0x9b0   : > { %v1603_v29 = vsel %vm361_vm0, 0.0, %v1602_v22  ;;  %v1615_v31 = vsel %vm361_vm0, %v1602_v22, %v1591_v43  ;;  %v1601_v61 = vsel %vm361_vm0, 0.0, %v1600_v21 }
 0x9b1   : > { %v1620_v54 = vrot.slane %v1603_v29, 4  ;;  %v1610_v2 = vsel %vm361_vm0, %v1609_v26, %v1597_v28  ;;  %v1619_v12 = vperm.slane %v1615_v31, %v2634_v58  ;;  %v1628_v60 = vrot.slane %v1608_v55, 4 }
 0x9b2   : > { %v1614_v33 = vperm.slane %v1610_v2, %v2634_v58 }
 0x9b3   : > { %v1621_v35 = vsel %vm361_vm0, %v1620_v54, %v1601_v61  ;;  %v1640_v36 = vrot.slane %v1619_v12, 4 }
 0x9b4   : > { %v1625_v38 = vperm.slane %v1621_v35, %v2634_v58  ;;  %v1629_v39 = vsel %vm361_vm0, %v1614_v33, %v1628_v60  ;;  %v1626_v18 = vrot.slane %v1614_v33, 4 }
 0x9b5   : > { %v1637_v40 = vperm.slane %v1629_v39, %v2645_v3 }
 0x9b6   : > { %v1641_v42 = vsel %vm361_vm0, %v1625_v38, %v1640_v36  ;;  %v1627_v44 = vsel %vm361_vm0, %v1626_v18, %v1608_v55  ;;  %v1638_v45 = vrot.slane %v1625_v38, 4 }
 0x9b7   : > { %v1649_v46 = vperm.slane %v1641_v42, %v2645_v3  ;;  %v1656_v47 = vrot.slane %v1637_v40, 4  ;;  %v1633_v49 = vperm.slane %v1627_v44, %v2645_v3 }
 0x9b8   : > { %v1639_v50 = vsel %vm361_vm0, %v1638_v45, %v1619_v12 }
 0x9b9   : > { %v1657_v52 = vsel %vm361_vm0, %v1649_v46, %v1656_v47  ;;  %v1645_v56 = vperm.slane %v1639_v50, %v2645_v3  ;;  %v1652_v57 = vrot.slane %v1633_v49, 4  ;;  %v1654_v62 = vrot.slane %v1649_v46, 4 }
 0x9ba   : > { %1893 = vmatpush.msrb.mxu0 %v1657_v52 }
 0x9bb   : > { %v1653_v0 = vsel %vm361_vm0, %v1645_v56, %v1652_v57  ;;  %v1655_v1 = vsel %vm361_vm0, %v1654_v62, %v1637_v40  ;;  %v1650_v53 = vrot.slane %v1645_v56, 4 }
 0x9bc   : > { %2189 = vmatpush.msra.mxu0 %v2993_v63  ;;  %1847 = vmatpush.msra.mxu2 %v1653_v0 }
 0x9bd   : > { %1870 = vmatpush.msrb.mxu3 %v1655_v1  ;;  %v1651_v30 = vsel %vm361_vm0, %v1650_v53, %v1633_v49 }
 0x9be   : > { %2190 = vmatpush.msra.mxu0 %v2999_v59  ;;  %1824 = vmatpush.msrb.mxu1 %v1651_v30 }
 0x9c0   : > { %2191 = vmatpush.msra.mxu0 %v3008_v25 }
 0x9c2   : > { %2192 = vmatpush.msra.mxu0 %v3016_v27 }
 0xa01   : > { %v1788_v48 = vpop.xlane.xlu1 %1787 }
 0xa02   : > { %2411 = vrcp.f32 %v1788_v48 }
 0xa06   : > { %v1794_v7 = vpop.xlane.xlu0 %1793 }
 0xa07   : > { %2413 = vrcp.f32 %v1794_v7 }
 0xa08   : > { %v2412_v8 = vpop.eup %2411 }
 0xa09   : > { %v1802_v9 = vmul.f32 %v2412_v8, %v3144_v32 }
 0xa0b   : > { %2288 = vmatmul.msk.f32.vlgmr.msrb.gmra.mxu1 %vm715_vm1, %v1802_v9 }
 0xa0d   : > { %v2414_v63 = vpop.eup %2413 }
 0xa0e   : > { %v1804_v10 = vmul.f32 %v2414_v63, %v3148_v34  ;;  %v1791_v51 = vpop.xlane.xlu0 %1790 }
 0xa0f   : > { %2415 = vrcp.f32 %v1791_v51 }
 0xa10   : > { %2290 = vmatmul.msk.f32.vlgmr.msrb.gmra.mxu3 %vm715_vm1, %v1804_v10 }
 0xa15   : > { %v2416_v59 = vpop.eup %2415 }
 0xa16   : > { %v1803_v25 = vmul.f32 %v2416_v59, %v3152_v37  ;;  %v1797_v27 = vpop.xlane.xlu0 %1796 }
 0xa17   : > { %2417 = vrcp.f32 %v1797_v27 }
 0xa18   : > { %2289 = vmatmul.msk.f32.vlgmr.msra.gmra.mxu2 %vm715_vm1, %v1803_v25 }
 0xa1d   : > { %v2418_v6 = vpop.eup %2417 }
 0xa1e   : > { %v1805_v11 = vmul.f32 %v2418_v6, %v3156_v41 }
 0xa20   : > { %2291 = vmatmul.msk.f32.vlgmr.msrb.gmra.mxu0 %vm715_vm1, %v1805_v11 }
 0xa88   : > { %v1826_v32 = vpop.f32.mrf.mxu1 }
 0xa89   : > { %v1900_v14 = vrot.slane %v1826_v32, 4 }
 0xa93   : > { %v1872_v13 = vpop.f32.mrf.mxu3 }
 0xa94   : > { %v1898_v34 = vrot.slane %v1872_v13, 4  ;;  %v1901_v15 = vsel %vm361_vm0, %v1872_v13, %v1900_v14 }
 0xa95   : > { %v1909_v16 = vperm.slane %v1901_v15, %v2634_v58 }
 0xa96   : > { %v1899_v43 = vsel %vm361_vm0, %v1898_v34, %v1826_v32 }
 0xa97   : > { %v1905_v19 = vperm.slane %v1899_v43, %v2634_v58  ;;  %v1936_v22 = vrot.slane %v1909_v16, 4 }
 0xa99   : > { %v1924_v28 = vrot.slane %v1905_v19, 4 }
 0xa9b   : > { %v1849_v37 = vpop.f32.mrf.mxu2 }
 0xa9c   : > { %v1912_v17 = vrot.slane %v1849_v37, 4 }
 0xa9d   : > { %v1895_v20 = vpop.f32.mrf.mxu0 }
 0xa9e   : > { %v1910_v21 = vrot.slane %v1895_v20, 4  ;;  %v1913_v41 = vsel %vm361_vm0, %v1895_v20, %v1912_v17  ;;  %v2292_v17 = vld [vmem:[%s3348_s3 + $0x80] sm:$0xff] }
 0xa9f   : > { %v1921_v23 = vperm.slane %v1913_v41, %v2634_v58 }
 0xaa0   : > { %v1911_v26 = vsel %vm361_vm0, %v1910_v21, %v1849_v37  ;;  %v2293_v37 = vld [vmem:[%s3348_s3 + $0x88] sm:$0xff] }
 0xaa1   : > { %v1917_v29 = vperm.slane %v1911_v26, %v2634_v58  ;;  %v1934_v55 = vrot.slane %v1921_v23, 4  ;;  %v1937_v31 = vsel %vm361_vm0, %v1921_v23, %v1936_v22  ;;  %v2374_v26 = vld [vmem:[%s3349_s4 + $0x9] ss:$0 sm:$0xff] }
 0xaa2   : > { %v1945_v54 = vperm.slane %v1937_v31, %v2645_v3 }
 0xaa3   : > { %v1922_v2 = vrot.slane %v1917_v29, 4  ;;  %v1925_v12 = vsel %vm361_vm0, %v1917_v29, %v1924_v28  ;;  %v1935_v61 = vsel %vm361_vm0, %v1934_v55, %v1909_v16  ;;  %v2295_v16 = vld [vmem:[%s3348_s3 + $0x98] sm:$0xff] }
 0xaa4   : > { %v1933_v33 = vperm.slane %v1925_v12, %v2645_v3  ;;  %v1941_v60 = vperm.slane %v1935_v61, %v2645_v3  ;;  %v1952_v35 = vrot.slane %v1945_v54, 4  ;;  %2045 = vmatpush.msra.mxu1 %v2295_v16 }
 0xaa5   : > { %v1923_v36 = vsel %vm361_vm0, %v1922_v2, %v1905_v19 }
 0xaa6   : > { %v1929_v38 = vperm.slane %v1923_v36, %v2645_v3  ;;  %v1948_v39 = vrot.slane %v1933_v33, 4  ;;  %v1950_v18 = vrot.slane %v1941_v60, 4  ;;  %v1953_v40 = vsel %vm361_vm0, 0.0, %v1952_v35  ;;  %v2303_v33 = vld [vmem:[%s3348_s3 + $0xb8] sm:$0xff]  ;;  %v2300_v36 = vld [vmem:[%s3348_s3 + $0xa0] sm:$0xff] }
 0xaa7   : > { %v1965_v42 = vsel %vm361_vm0, %v1952_v35, %v1941_v60  ;;  %v1970_v44 = vrot.slane %v1953_v40, 4  ;;  %2111 = vmatpush.msrb.mxu2 %v2303_v33  ;;  %v2302_v60 = vld [vmem:[%s3348_s3 + $0xb0] sm:$0xff]  ;;  %v2301_v35 = vld [vmem:[%s3348_s3 + $0xa8] sm:$0xff] }
 0xaa8   : > { %v1946_v45 = vrot.slane %v1929_v38, 4  ;;  %v1949_v46 = vsel %vm361_vm0, 0.0, %v1948_v39  ;;  %v1951_v47 = vsel %vm361_vm0, 0.0, %v1950_v18  ;;  %v1969_v49 = vperm.slane %v1965_v42, %v2634_v58  ;;  %v2309_v42 = vld [vmem:[%s3348_s3 + $0xe8] sm:$0xff] }
 0xaa9   : > { %v1959_v50 = vrot.slane %v1949_v46, 4  ;;  %v1954_v52 = vsel %vm361_vm0, %v1948_v39, %v1929_v38  ;;  %v1971_v56 = vsel %vm361_vm0, %v1970_v44, %v1951_v47  ;;  %2112 = vmatpush.msrb.mxu2 %v2302_v60  ;;  %v2311_v38 = vld [vmem:[%s3348_s3 + $0xf8] sm:$0xff]  ;;  %v2310_v39 = vld [vmem:[%s3348_s3 + $0xf0] sm:$0xff] }
 0xaaa   : > { %v1947_v57 = vsel %vm361_vm0, 0.0, %v1946_v45  ;;  %v1958_v62 = vperm.slane %v1954_v52, %v2634_v58  ;;  %v1975_v0 = vperm.slane %v1971_v56, %v2634_v58  ;;  %v1990_v1 = vrot.slane %v1969_v49, 4  ;;  %2133 = vmatpush.msra.mxu3 %v2311_v38  ;;  %v2308_v45 = vld [vmem:[%s3348_s3 + $0xe0] sm:$0xff]  ;;  %v2307_v46 = vld [vmem:[%s3348_s3 + $0xd8] sm:$0xff] }
 0xaab   : > { %v1960_v53 = vsel %vm361_vm0, %v1959_v50, %v1947_v57  ;;  %2113 = vmatpush.msrb.mxu2 %v2301_v35 }
 0xaac   : > { %v1964_v30 = vperm.slane %v1960_v53, %v2634_v58  ;;  %v1978_v48 = vrot.slane %v1958_v62, 4  ;;  %v1991_v7 = vsel %vm361_vm0, %v1975_v0, %v1990_v1  ;;  %v1988_v8 = vrot.slane %v1975_v0, 4  ;;  %2134 = vmatpush.msra.mxu3 %v2310_v39  ;;  %v2376_v1 = vld [vmem:[%s3349_s4 + $0xb] ss:$0 sm:$0xff] }
 0xaad   : > { %v1999_v9 = vperm.slane %v1991_v7, %v2645_v3  ;;  %2114 = vmatpush.msrb.mxu2 %v2300_v36 }
 0xaae   : > { %v1979_v63 = vsel %vm361_vm0, %v1964_v30, %v1978_v48  ;;  %v1976_v10 = vrot.slane %v1964_v30, 4  ;;  %v1989_v51 = vsel %vm361_vm0, %v1988_v8, %v1969_v49  ;;  %2135 = vmatpush.msra.mxu3 %v2309_v42  ;;  %v2306_v8 = vld [vmem:[%s3348_s3 + $0xd0] sm:$0xff] }
 0xaaf   : > { %v1987_v59 = vperm.slane %v1979_v63, %v2645_v3  ;;  %v2004_v25 = vrot.slane %v1999_v9, 4  ;;  %v1995_v27 = vperm.slane %v1989_v51, %v2645_v3  ;;  %v2304_v63 = vld [vmem:[%s3348_s3 + $0xc0] sm:$0xff] }
 0xab0   : > { %v1977_v6 = vsel %vm361_vm0, %v1976_v10, %v1958_v62  ;;  %2136 = vmatpush.msra.mxu3 %v2308_v45  ;;  %v2375_v62 = vld [vmem:[%s3349_s4 + $0xa] ss:$0 sm:$0xff] }
 0xab1   : > { %v2005_v58 = vsel %vm361_vm0, %v2004_v25, %v1987_v59  ;;  %v1983_v11 = vperm.slane %v1977_v6, %v2645_v3  ;;  %v2000_v32 = vrot.slane %v1995_v27, 4  ;;  %v2006_v15 = vrot.slane %v1987_v59, 4  ;;  %v2294_v3 = vld [vmem:[%s3348_s3 + $0x90] sm:$0xff]  ;;  %v2378_v25 = vld [vmem:[%s3349_s4 + $0xd] ss:$0 sm:$0xff] }
 0xab2   : > { %2013 = vrot.lane.b32.xlu0 %v2005_v58, %s2454_s21  ;;  %2046 = vmatpush.msra.mxu1 %v2294_v3 }
 0xab3   : > { %v2002_v13 = vrot.slane %v1983_v11, 4  ;;  %v2001_v14 = vsel %vm361_vm0, %v2000_v32, %v1983_v11  ;;  %v2007_v43 = vsel %vm361_vm0, %v1999_v9, %v2006_v15  ;;  %2137 = vmatpush.msra.mxu3 %v2307_v46  ;;  %v2305_v9 = vld [vmem:[%s3348_s3 + $0xc8] sm:$0xff] }
 0xab4   : > { %2047 = vmatpush.msra.mxu1 %v2293_v37 }
 0xab5   : > { %v2003_v34 = vsel %vm361_vm0, %v1995_v27, %v2002_v13  ;;  %2138 = vmatpush.msra.mxu3 %v2306_v8 }
 0xab6   : > { %2009 = vrot.lane.b32.xlu2 %v2003_v34, %s2455_s22  ;;  %2048 = vmatpush.msra.mxu1 %v2292_v17 }
 0xab7   : > { %2139 = vmatpush.msra.mxu3 %v2305_v9 }
 0xab9   : > { %2140 = vmatpush.msra.mxu3 %v2304_v63 }
 0xabe   : > { %2017 = vrot.lane.b32.xlu2 %v2007_v43, %s2456_s23 }
 0xb10   : > { %v2010_v19 = vpop.permute.xlu2 %2009 }
 0xb11   : > { %v2020_v20 = vsel %vm715_vm1, %v2001_v14, %v2010_v19 }
 0xb18   : > { %v2018_v41 = vpop.permute.xlu2 %2017 }
 0xb24   : > { %v2014_v21 = vpop.permute.xlu0 %2013 }
 0xb25   : > { %v2021_v22 = vsel %vm1079_vm2, %v2020_v20, %v2014_v21 }
 0xb26   : > { %v2022_v23 = vsel %vm1081_vm3, %v2021_v22, %v2018_v41  ;;  %v2379_v41 = vld [vmem:[%s3349_s4 + $0xe] ss:$0 sm:$0xff] }
 0xb27   : > { %2297 = vmatmul.msk.f32.vlgmr.msra.gmra.mxu1 %vm326_vm15, %v2022_v23 }
 0xba4   : > { %v2050_v28 = vpop.f32.mrf.mxu1 }
 0xba5   : > { %v2051_v29 = vadd.f32 %v2374_v26, %v2050_v28 }
 0xba7   : > { %v2055_v55 = vsel %vm326_vm15, %v2051_v29, 0.0 }
 0xba8   : > { %2056 = vadd.xlane.f32.xlu2 %v2055_v55 }
 0xc1b   : > { %v2057_v31 = vpop.xlane.xlu2 %2056 }
 0xc1c   : > { %v2058_v54 = vmul.f32 %v2057_v31, %v2885_v24 }
 0xc1e   : > { %v2059_v2 = vsub.f32 %v2051_v29, %v2058_v54 }
 0xc20   : > { %v2060_v12 = vmul.f32 %v2059_v2, %v2059_v2 }
 0xc22   : > { %v2061_v61 = vsel %vm326_vm15, %v2060_v12, 0.0 }
 0xc23   : > { %2062 = vadd.xlane.f32.xlu0 %v2061_v61 }
 0xc96   : > { %v2063_v18 = vpop.xlane.xlu0 %2062 }
 0xc97   : > { %v2064_v40 = vmul.f32 %v2063_v18, %v2885_v24 }
 0xc99   : > { %v2065_v44 = vadd.f32 1e-05, %v2064_v40 }
 0xc9b   : > { %2419 = vrsqrt.f32 %v2065_v44  ;;  %vm2072_vm13 = vweird.f32 %v2065_v44 }
 0xca1   : > { %v2420_v47 = vpop.eup %2419 }
 0xca2   : > { %v2067_v49 = vmul.f32 %v2420_v47, %v2065_v44  ;;  %vm2073_vm12 = vweird.f32 %v2420_v47 }
 0xca3   : > { %vm2074_vm14 = vmor %vm2072_vm13, %vm2073_vm12 }
 0xca4   : > { %v2068_v50 = vmul.f32 %v2420_v47, %v2067_v49 }
 0xca6   : > { %v2069_v52 = vmul.f32 0.5, %v2068_v50 }
 0xca8   : > { %v2070_v56 = vsub.f32 1.5, %v2069_v52 }
 0xcaa   : > { %v2071_v57 = vmul.f32 %v2420_v47, %v2070_v56 }
 0xcac   : > { %v2075_v0 = vsel %vm2074_vm14, %v2420_v47, %v2071_v57 }
 0xcad   : > { %v2076_v53 = vmul.f32 %v2075_v0, %v2059_v2 }
 0xcaf   : > { %v2078_v30 = vmul.f32 %v2375_v62, %v2076_v53 }
 0xcb1   : > { %v2080_v48 = vadd.f32 %v2376_v1, %v2078_v30 }
 0xcb3   : > { %v2081_v7 = vadd.f32 %v2080_v48, %v2936_v5  ;;  %v2377_v5 = vld [vmem:[%s3349_s4 + $0xc] ss:$0 sm:$0xff] }
 0xcb5   : > { %2313 = vmatmul.msk.f32.vlgmr.msrb.gmra.mxu2 %vm326_vm15, %v2081_v7 }
 0xd38   : > { %v2116_v10 = vpop.f32.mrf.mxu2 }
 0xd39   : > { %v2117_v51 = vadd.f32 %v2377_v5, %v2116_v10 }
 0xd3b   : > { %v2119_v59 = vmax.f32 %v2117_v51, 0.0 }
 0xd3d   : > { %2315 = vmatmul.msk.f32.vlgmr.msra.gmra.mxu3 %vm1188_vm8, %v2119_v59 }
 0xdc0   : > { %v2142_v27 = vpop.f32.mrf.mxu3 }
 0xdc1   : > { %v2143_v6 = vadd.f32 %v2378_v25, %v2142_v27 }
 0xdc3   : > { %v2147_v58 = vsel %vm326_vm15, %v2143_v6, 0.0 }
 0xdc4   : > { %2148 = vadd.xlane.f32.xlu1 %v2147_v58 }
 0xe37   : > { %v2149_v11 = vpop.xlane.xlu1 %2148 }
 0xe38   : > { %v2150_v32 = vmul.f32 %v2149_v11, %v2885_v24 }
 0xe3a   : > { %v2151_v13 = vsub.f32 %v2143_v6, %v2150_v32 }
 0xe3c   : > { %v2152_v14 = vmul.f32 %v2151_v13, %v2151_v13 }
 0xe3e   : > { %v2153_v34 = vsel %vm326_vm15, %v2152_v14, 0.0 }
 0xe3f   : > { %2154 = vadd.xlane.f32.xlu1 %v2153_v34 }
 0xeb2   : > { %v2155_v15 = vpop.xlane.xlu1 %2154 }
 0xeb3   : > { %v2156_v43 = vmul.f32 %v2155_v15, %v2885_v24  ;;  %v2380_v24 = vld [vmem:[%s3349_s4 + $0xf] ss:$0 sm:$0xff] }
 0xeb5   : > { %v2157_v16 = vadd.f32 1e-05, %v2156_v43 }
 0xeb7   : > { %2421 = vrsqrt.f32 %v2157_v16  ;;  %vm2164_vm1 = vweird.f32 %v2157_v16 }
 0xebd   : > { %v2422_v3 = vpop.eup %2421 }
 0xebe   : > { %v2159_v37 = vmul.f32 %v2422_v3, %v2157_v16  ;;  %vm2165_vm0 = vweird.f32 %v2422_v3 }
 0xebf   : > { %vm2166_vm2 = vmor %vm2164_vm1, %vm2165_vm0 }
 0xec0   : > { %v2160_v17 = vmul.f32 %v2422_v3, %v2159_v37 }
 0xec2   : > { %v2161_v19 = vmul.f32 0.5, %v2160_v17 }
 0xec4   : > { %v2162_v20 = vsub.f32 1.5, %v2161_v19 }
 0xec6   : > { %v2163_v21 = vmul.f32 %v2422_v3, %v2162_v20 }
 0xec8   : > { %v2167_v22 = vsel %vm2166_vm2, %v2422_v3, %v2163_v21 }
 0xec9   : > { %v2168_v23 = vmul.f32 %v2167_v22, %v2151_v13 }
 0xecb   : > { %v2170_v26 = vmul.f32 %v2379_v41, %v2168_v23 }
 0xecd   : > { %v2172_v28 = vadd.f32 %v2380_v24, %v2170_v26 }
 0xecf   : > { %v2173_v29 = vadd.f32 %v2172_v28, %v2081_v7 }
 0xed1   : > { %2318 = vmatmul.msk.f32.vlgmr.msra.gmra.mxu0 %vm326_vm15, %v2173_v29 }
 0xf4e   : > { %v2194_v55 = vpop.f32.mrf.mxu0 }
 0xf4f   : > { %v2195_v31 = vadd.f32 %v3125_v4, %v2194_v55 }
 0xf51   : > { %2319 = vst [vmem:[%s3130_s8 + $0x8] sm:$0xff] %v2195_v31 }
 0xf52 PF: > { %s24_s25 = sadd.s32 1, %s2443_s25  }
 0xf53   : > { %p21_p4 = scmp.ge.s32.totalorder %s24_s25, 4  }
 0xf55   :  { %23 = sbr.rel (!%p21_p4) target bundleno = 7 (0x7), region = 71 }

</bundles_post_ra>
